<compile_context>
chip_gen: v6e
topology: v6e:2x2x1
jax: 0.10.0
libtpu: 0.0.40
codegen_flags: <defaults>
</compile_context>

<pallas_src>
import jax
import jax.numpy as jnp
import numpy as np
from jax.experimental import pallas as pl
from jax.experimental.pallas import tpu as pltpu

EPS = 1e-5  # nn.BatchNorm1d default eps


def lattice_rnn_kernel(x_ref, hext_ref, cext_ref, hst_ref, cst_ref,
                       whp_ref, bhp_ref, wcp_ref, bcp_ref,
                       wih_ref, bih_ref, whh_ref, bhh_ref,
                       wout_ref, bout_ref, gamma_ref, beta_ref,
                       out_ref, fh_ref, fc_ref, hnew_ref, cnew_ref):
    L = x_ref.shape[0]
    H = hext_ref.shape[1]

    # ---- Off-chain (recurrence-independent) work, batched over the chain ----
    # Time-neighbor halves of hidden/cell processors: h_time @ W_hp[H:] + b_hp.
    th = jnp.einsum('lbh,lhk->lbk', hst_ref[...], whp_ref[:, H:, :],
                    preferred_element_type=jnp.float32) + bhp_ref[...]
    tc = jnp.einsum('lbh,lhk->lbk', cst_ref[...], wcp_ref[:, H:, :],
                    preferred_element_type=jnp.float32) + bcp_ref[...]
    # LSTM input-path gate contribution (K=1 -> VPU broadcast, no MXU push).
    xg = x_ref[...] * wih_ref[...] + bih_ref[...] + bhh_ref[...]   # (L, B, 4H)

    # i == 0 -> the "space" neighbor is the external (h_ext, c_ext) state.
    h_sp = hext_ref[...]          # (B, H)
    c_sp = cext_ref[...]

    # Strictly serial chain, fully unrolled in one basic block.
    for i in range(L):
        w_hp_s = whp_ref[i, :H]   # (H, H) space-neighbor half of Linear(2H, H)
        w_cp_s = wcp_ref[i, :H]

        # hidden_processor / cell_processor == Linear(2H, H) + ReLU
        # (fc_layers == [0]); the time half (th/tc) was precomputed above.
        ph = jnp.maximum(
            jnp.dot(h_sp, w_hp_s, preferred_element_type=jnp.float32) + th[i],
            0.0)
        pc = jnp.maximum(
            jnp.dot(c_sp, w_cp_s, preferred_element_type=jnp.float32) + tc[i],
            0.0)

        # LSTMCell(input_size=1, hidden_size=H); PyTorch gate order i, f, g, o.
        gates = xg[i] + jnp.dot(ph, whh_ref[i],
                                preferred_element_type=jnp.float32)  # (B, 4H)

        sg = jax.nn.sigmoid(gates)                # i / f / o gates
        i_g = sg[:, 0 * H:1 * H]
        f_g = sg[:, 1 * H:2 * H]
        o_g = sg[:, 3 * H:4 * H]
        g_g = jnp.tanh(gates[:, 2 * H:3 * H])     # tanh only on the g slice

        c_new = f_g * pc + i_g * g_g
        h_new = o_g * jnp.tanh(c_new)

        hnew_ref[i] = h_new                       # VMEM-resident output
        cnew_ref[i] = c_new
        h_sp = h_new                              # space neighbor for cell i+1
        c_sp = c_new

    # Output head: Linear(2H, O)+ReLU -> BatchNorm1d (batch stats) -> sigmoid.
    w_out = wout_ref[...]                         # (2H, O)
    out = jnp.maximum(
        jnp.dot(h_sp, w_out[:H], preferred_element_type=jnp.float32)
        + jnp.dot(c_sp, w_out[H:], preferred_element_type=jnp.float32)
        + bout_ref[...], 0.0)
    # BatchNorm1d training-mode forward (batch statistics, biased variance).
    # TODO(synk): running_mean/running_var buffer updates (a training-time side
    # effect) are not reproduced; only the normalization itself is.
    mean = jnp.mean(out, axis=0, keepdims=True)
    var = jnp.mean((out - mean) ** 2, axis=0, keepdims=True)
    out_bn = (out - mean) * jax.lax.rsqrt(var + EPS) * gamma_ref[...] \
        + beta_ref[...]
    out_ref[...] = jax.nn.sigmoid(out_bn)
    fh_ref[...] = h_sp
    fc_ref[...] = c_sp


def lattice_rnn_forward(x, h_ext, c_ext, h_states, c_states, params):
    """x: [B, L, 1]  (matches PyTorch x, which is squeeze(2)'d in forward)."""
    B, L, _ = x.shape
    H = h_ext.shape[1]
    O = params["W_out"].shape[1]

    x_lbi = jnp.transpose(x.astype(jnp.float32), (1, 0, 2))  # [L, B, 1]

    def vmem():
        return pl.BlockSpec(memory_space=pltpu.MemorySpace.VMEM)

    n_inputs = 17
    call = pl.pallas_call(
        lattice_rnn_kernel,
        out_shape=(
            jax.ShapeDtypeStruct((B, O), jnp.float32),      # output
            jax.ShapeDtypeStruct((B, H), jnp.float32),      # final_h
            jax.ShapeDtypeStruct((B, H), jnp.float32),      # final_c
            jax.ShapeDtypeStruct((L, B, H), jnp.float32),   # updated h states
            jax.ShapeDtypeStruct((L, B, H), jnp.float32),   # updated c states
        ),
        in_specs=[vmem() for _ in range(n_inputs)],
        out_specs=tuple(vmem() for _ in range(5)),
        compiler_params=pltpu.CompilerParams(vmem_limit_bytes=64 << 20),
    )
    return call(x_lbi, h_ext, c_ext, h_states, c_states,
                params["W_hp"], params["b_hp"], params["W_cp"], params["b_cp"],
                params["W_ih"], params["b_ih"], params["W_hh"], params["b_hh"],
                params["W_out"], params["b_out"],
                params["gamma"], params["beta"])


def lattice_rnn_reference(x, h_ext, c_ext, h_states, c_states, p):
    """Pure-JAX reference mirroring the PyTorch forward (fc_layers = [0])."""
    B, L, _ = x.shape
    H = h_ext.shape[1]
    xs = x[..., 0].astype(jnp.float32)      # [B, L]
    h_sp, c_sp = h_ext, c_ext
    new_h = [h_states[i] for i in range(L)]
    new_c = [c_states[i] for i in range(L)]
    for i in range(L):
        h_time, c_time = new_h[i], new_c[i]
        ch = jnp.concatenate([h_sp, h_time], axis=1)
        cc = jnp.concatenate([c_sp, c_time], axis=1)
        ph = jax.nn.relu(ch @ p["W_hp"][i] + p["b_hp"][i])
        pc = jax.nn.relu(cc @ p["W_cp"][i] + p["b_cp"][i])
        x_i = xs[:, i:i + 1]
        gates = (x_i @ p["W_ih"][i] + p["b_ih"][i]
                 + ph @ p["W_hh"][i] + p["b_hh"][i])
        i_g = jax.nn.sigmoid(gates[:, :H])
        f_g = jax.nn.sigmoid(gates[:, H:2 * H])
        g_g = jnp.tanh(gates[:, 2 * H:3 * H])
        o_g = jax.nn.sigmoid(gates[:, 3 * H:])
        c_n = f_g * pc + i_g * g_g
        h_n = o_g * jnp.tanh(c_n)
        new_h[i], new_c[i] = h_n, c_n
        h_sp, c_sp = h_n, c_n
    final = jnp.concatenate([new_h[-1], new_c[-1]], axis=1)
    out = jax.nn.relu(final @ p["W_out"] + p["b_out"])
    mean = jnp.mean(out, axis=0, keepdims=True)
    var = jnp.mean((out - mean) ** 2, axis=0, keepdims=True)
    out = (out - mean) * jax.lax.rsqrt(var + EPS) * p["gamma"] + p["beta"]
    out = jax.nn.sigmoid(out)
    return out, new_h[-1], new_c[-1], jnp.stack(new_h), jnp.stack(new_c)


def init_params(key, L, H, O):
    ks = jax.random.split(key, 10)
    s = 0.1
    p = {
        "W_hp": s * jax.random.normal(ks[0], (L, 2 * H, H), jnp.float32),
        "b_hp": s * jax.random.normal(ks[1], (L, 1, H), jnp.float32),
        "W_cp": s * jax.random.normal(ks[2], (L, 2 * H, H), jnp.float32),
        "b_cp": s * jax.random.normal(ks[3], (L, 1, H), jnp.float32),
        "W_ih": s * jax.random.normal(ks[4], (L, 1, 4 * H), jnp.float32),
        "b_ih": s * jax.random.normal(ks[5], (L, 1, 4 * H), jnp.float32),
        "W_hh": s * jax.random.normal(ks[6], (L, H, 4 * H), jnp.float32),
        "b_hh": s * jax.random.normal(ks[7], (L, 1, 4 * H), jnp.float32),
        "W_out": s * jax.random.normal(ks[8], (2 * H, O), jnp.float32),
        "b_out": s * jax.random.normal(ks[9], (1, O), jnp.float32),
        "gamma": jnp.ones((1, O), jnp.float32),   # BatchNorm1d default weight
        "beta": jnp.zeros((1, O), jnp.float32),   # BatchNorm1d default bias
    }
    return p


if __name__ == "__main__":
    B, H, L, O = 8, 32, 8, 8   # batch, hidden_size, chain_length, output_size
    key = jax.random.PRNGKey(0)
    k_x, k_h, k_c, k_hs, k_cs, k_p = jax.random.split(key, 6)

    x = jax.random.normal(k_x, (B, L, 1), jnp.float32)          # [B, length, 1]
    h_ext = jax.random.normal(k_h, (B, H), jnp.float32)
    c_ext = jax.random.normal(k_c, (B, H), jnp.float32)
    h_states = jax.random.normal(k_hs, (L, B, H), jnp.float32)  # chain h states
    c_states = jax.random.normal(k_cs, (L, B, H), jnp.float32)  # chain c states
    params = init_params(k_p, L, H, O)

    outs = lattice_rnn_forward(x, h_ext, c_ext, h_states, c_states, params)
    outs = jax.block_until_ready(outs)

    refs = lattice_rnn_reference(x, h_ext, c_ext, h_states, c_states, params)
    for got, want in zip(outs, refs):
        np.testing.assert_allclose(np.asarray(got), np.asarray(want),
                                   rtol=1e-5, atol=1e-5)

    print("KERNEL_OK")
</pallas_src>

<mosaic_0001>
module attributes {stable_mosaic.version = 11 : i64} {
  func.func @lattice_rnn_kernel(%arg0: memref<8x8x1xf32, #tpu.memory_space<vmem>>, %arg1: memref<8x32xf32, #tpu.memory_space<vmem>>, %arg2: memref<8x32xf32, #tpu.memory_space<vmem>>, %arg3: memref<8x8x32xf32, #tpu.memory_space<vmem>>, %arg4: memref<8x8x32xf32, #tpu.memory_space<vmem>>, %arg5: memref<8x64x32xf32, #tpu.memory_space<vmem>>, %arg6: memref<8x1x32xf32, #tpu.memory_space<vmem>>, %arg7: memref<8x64x32xf32, #tpu.memory_space<vmem>>, %arg8: memref<8x1x32xf32, #tpu.memory_space<vmem>>, %arg9: memref<8x1x128xf32, #tpu.memory_space<vmem>>, %arg10: memref<8x1x128xf32, #tpu.memory_space<vmem>>, %arg11: memref<8x32x128xf32, #tpu.memory_space<vmem>>, %arg12: memref<8x1x128xf32, #tpu.memory_space<vmem>>, %arg13: memref<64x8xf32, #tpu.memory_space<vmem>>, %arg14: memref<1x8xf32, #tpu.memory_space<vmem>>, %arg15: memref<1x8xf32, #tpu.memory_space<vmem>>, %arg16: memref<1x8xf32, #tpu.memory_space<vmem>>, %arg17: memref<8x8xf32, #tpu.memory_space<vmem>>, %arg18: memref<8x32xf32, #tpu.memory_space<vmem>>, %arg19: memref<8x32xf32, #tpu.memory_space<vmem>>, %arg20: memref<8x8x32xf32, #tpu.memory_space<vmem>>, %arg21: memref<8x8x32xf32, #tpu.memory_space<vmem>>) attributes {dimension_semantics = [], scalar_prefetch = 0 : i64, scratch_operands = 0 : i64, tpu.core_type = #tpu.core_type<tc>} {
    %c0 = arith.constant 0 : index
    %c0_0 = arith.constant 0 : index
    %c0_1 = arith.constant 0 : index
    %0 = vector.load %arg3[%c0, %c0_0, %c0_1] : memref<8x8x32xf32, #tpu.memory_space<vmem>>, vector<8x8x32xf32>
    %c0_2 = arith.constant 0 : index
    %c32 = arith.constant 32 : index
    %c0_3 = arith.constant 0 : index
    %1 = vector.load %arg5[%c0_2, %c32, %c0_3] : memref<8x64x32xf32, #tpu.memory_space<vmem>>, vector<8x32x32xf32>
    "tpu.trace_start"() <{level = 10 : i32, message = "lbh,lhk->lbk"}> : () -> ()
    %cst = arith.constant dense<0.000000e+00> : vector<8x8x32xf32>
    %2 = tpu.matmul %0, %1, %cst {dimension_numbers = #tpu.dot_dimension_numbers<[2], [1], [1], [2], [0, 0, 0, 1, 1, 2], [0], [0]>} : vector<8x8x32xf32>, vector<8x32x32xf32>, vector<8x8x32xf32> -> vector<8x8x32xf32>
    "tpu.trace_stop"() : () -> ()
    %c0_4 = arith.constant 0 : index
    %c0_5 = arith.constant 0 : index
    %c0_6 = arith.constant 0 : index
    %3 = vector.load %arg6[%c0_4, %c0_5, %c0_6] : memref<8x1x32xf32, #tpu.memory_space<vmem>>, vector<8x1x32xf32>
    %4 = vector.broadcast %3 : vector<8x1x32xf32> to vector<8x8x32xf32>
    %5 = arith.addf %2, %4 : vector<8x8x32xf32>
    %c0_7 = arith.constant 0 : index
    %c0_8 = arith.constant 0 : index
    %c0_9 = arith.constant 0 : index
    %6 = vector.load %arg4[%c0_7, %c0_8, %c0_9] : memref<8x8x32xf32, #tpu.memory_space<vmem>>, vector<8x8x32xf32>
    %c0_10 = arith.constant 0 : index
    %c32_11 = arith.constant 32 : index
    %c0_12 = arith.constant 0 : index
    %7 = vector.load %arg7[%c0_10, %c32_11, %c0_12] : memref<8x64x32xf32, #tpu.memory_space<vmem>>, vector<8x32x32xf32>
    "tpu.trace_start"() <{level = 10 : i32, message = "lbh,lhk->lbk"}> : () -> ()
    %cst_13 = arith.constant dense<0.000000e+00> : vector<8x8x32xf32>
    %8 = tpu.matmul %6, %7, %cst_13 {dimension_numbers = #tpu.dot_dimension_numbers<[2], [1], [1], [2], [0, 0, 0, 1, 1, 2], [0], [0]>} : vector<8x8x32xf32>, vector<8x32x32xf32>, vector<8x8x32xf32> -> vector<8x8x32xf32>
    "tpu.trace_stop"() : () -> ()
    %c0_14 = arith.constant 0 : index
    %c0_15 = arith.constant 0 : index
    %c0_16 = arith.constant 0 : index
    %9 = vector.load %arg8[%c0_14, %c0_15, %c0_16] : memref<8x1x32xf32, #tpu.memory_space<vmem>>, vector<8x1x32xf32>
    %10 = vector.broadcast %9 : vector<8x1x32xf32> to vector<8x8x32xf32>
    %11 = arith.addf %8, %10 : vector<8x8x32xf32>
    %c0_17 = arith.constant 0 : index
    %c0_18 = arith.constant 0 : index
    %c0_19 = arith.constant 0 : index
    %12 = vector.load %arg0[%c0_17, %c0_18, %c0_19] : memref<8x8x1xf32, #tpu.memory_space<vmem>>, vector<8x8x1xf32>
    %c0_20 = arith.constant 0 : index
    %c0_21 = arith.constant 0 : index
    %c0_22 = arith.constant 0 : index
    %13 = vector.load %arg9[%c0_20, %c0_21, %c0_22] : memref<8x1x128xf32, #tpu.memory_space<vmem>>, vector<8x1x128xf32>
    %14 = vector.broadcast %12 : vector<8x8x1xf32> to vector<8x8x128xf32>
    %15 = vector.broadcast %13 : vector<8x1x128xf32> to vector<8x8x128xf32>
    %16 = arith.mulf %14, %15 : vector<8x8x128xf32>
    %c0_23 = arith.constant 0 : index
    %c0_24 = arith.constant 0 : index
    %c0_25 = arith.constant 0 : index
    %17 = vector.load %arg10[%c0_23, %c0_24, %c0_25] : memref<8x1x128xf32, #tpu.memory_space<vmem>>, vector<8x1x128xf32>
    %18 = vector.broadcast %17 : vector<8x1x128xf32> to vector<8x8x128xf32>
    %19 = arith.addf %16, %18 : vector<8x8x128xf32>
    %c0_26 = arith.constant 0 : index
    %c0_27 = arith.constant 0 : index
    %c0_28 = arith.constant 0 : index
    %20 = vector.load %arg12[%c0_26, %c0_27, %c0_28] : memref<8x1x128xf32, #tpu.memory_space<vmem>>, vector<8x1x128xf32>
    %21 = vector.broadcast %20 : vector<8x1x128xf32> to vector<8x8x128xf32>
    %22 = arith.addf %19, %21 : vector<8x8x128xf32>
    %c0_29 = arith.constant 0 : index
    %c0_30 = arith.constant 0 : index
    %23 = vector.load %arg1[%c0_29, %c0_30] : memref<8x32xf32, #tpu.memory_space<vmem>>, vector<8x32xf32>
    %c0_31 = arith.constant 0 : index
    %c0_32 = arith.constant 0 : index
    %24 = vector.load %arg2[%c0_31, %c0_32] : memref<8x32xf32, #tpu.memory_space<vmem>>, vector<8x32xf32>
    %c0_33 = arith.constant 0 : index
    %c0_34 = arith.constant 0 : index
    %c0_35 = arith.constant 0 : index
    %25 = vector.load %arg5[%c0_33, %c0_34, %c0_35] : memref<8x64x32xf32, #tpu.memory_space<vmem>>, vector<1x32x32xf32>
    %26 = vector.shape_cast %25 : vector<1x32x32xf32> to vector<32x32xf32>
    %c0_36 = arith.constant 0 : index
    %c0_37 = arith.constant 0 : index
    %c0_38 = arith.constant 0 : index
    %27 = vector.load %arg7[%c0_36, %c0_37, %c0_38] : memref<8x64x32xf32, #tpu.memory_space<vmem>>, vector<1x32x32xf32>
    %28 = vector.shape_cast %27 : vector<1x32x32xf32> to vector<32x32xf32>
    %cst_39 = arith.constant dense<0.000000e+00> : vector<8x32xf32>
    %29 = tpu.matmul %23, %26, %cst_39 {dimension_numbers = #tpu.dot_dimension_numbers<[1], [0], [0], [1], [0, 0, 1, 1], [], []>} : vector<8x32xf32>, vector<32x32xf32>, vector<8x32xf32> -> vector<8x32xf32>
    %30 = vector.extract_strided_slice %5 {offsets = [0, 0, 0], sizes = [1, 8, 32], strides = [1, 1, 1]} : vector<8x8x32xf32> to vector<1x8x32xf32>
    %31 = vector.shape_cast %30 : vector<1x8x32xf32> to vector<8x32xf32>
    %32 = arith.addf %29, %31 : vector<8x32xf32>
    %cst_40 = arith.constant 0.000000e+00 : f32
    %33 = vector.broadcast %cst_40 : f32 to vector<8x32xf32>
    %34 = arith.maximumf %32, %33 : vector<8x32xf32>
    %cst_41 = arith.constant dense<0.000000e+00> : vector<8x32xf32>
    %35 = tpu.matmul %24, %28, %cst_41 {dimension_numbers = #tpu.dot_dimension_numbers<[1], [0], [0], [1], [0, 0, 1, 1], [], []>} : vector<8x32xf32>, vector<32x32xf32>, vector<8x32xf32> -> vector<8x32xf32>
    %36 = vector.extract_strided_slice %11 {offsets = [0, 0, 0], sizes = [1, 8, 32], strides = [1, 1, 1]} : vector<8x8x32xf32> to vector<1x8x32xf32>
    %37 = vector.shape_cast %36 : vector<1x8x32xf32> to vector<8x32xf32>
    %38 = arith.addf %35, %37 : vector<8x32xf32>
    %cst_42 = arith.constant 0.000000e+00 : f32
    %39 = vector.broadcast %cst_42 : f32 to vector<8x32xf32>
    %40 = arith.maximumf %38, %39 : vector<8x32xf32>
    %41 = vector.extract_strided_slice %22 {offsets = [0, 0, 0], sizes = [1, 8, 128], strides = [1, 1, 1]} : vector<8x8x128xf32> to vector<1x8x128xf32>
    %42 = vector.shape_cast %41 : vector<1x8x128xf32> to vector<8x128xf32>
    %c0_43 = arith.constant 0 : index
    %c0_44 = arith.constant 0 : index
    %c0_45 = arith.constant 0 : index
    %43 = vector.load %arg11[%c0_43, %c0_44, %c0_45] : memref<8x32x128xf32, #tpu.memory_space<vmem>>, vector<1x32x128xf32>
    %44 = vector.shape_cast %43 : vector<1x32x128xf32> to vector<32x128xf32>
    %cst_46 = arith.constant dense<0.000000e+00> : vector<8x128xf32>
    %45 = tpu.matmul %34, %44, %cst_46 {dimension_numbers = #tpu.dot_dimension_numbers<[1], [0], [0], [1], [0, 0, 1, 1], [], []>} : vector<8x32xf32>, vector<32x128xf32>, vector<8x128xf32> -> vector<8x128xf32>
    %46 = arith.addf %42, %45 : vector<8x128xf32>
    %47 = arith.negf %46 : vector<8x128xf32>
    %48 = math.exp %47 : vector<8x128xf32>
    %cst_47 = arith.constant 1.000000e+00 : f32
    %49 = vector.broadcast %cst_47 : f32 to vector<8x128xf32>
    %50 = arith.addf %49, %48 : vector<8x128xf32>
    %51 = arith.divf %49, %50 : vector<8x128xf32>
    %52 = vector.extract_strided_slice %51 {offsets = [0, 0], sizes = [8, 32], strides = [1, 1]} : vector<8x128xf32> to vector<8x32xf32>
    %53 = vector.extract_strided_slice %51 {offsets = [0, 32], sizes = [8, 32], strides = [1, 1]} : vector<8x128xf32> to vector<8x32xf32>
    %54 = vector.extract_strided_slice %51 {offsets = [0, 96], sizes = [8, 32], strides = [1, 1]} : vector<8x128xf32> to vector<8x32xf32>
    %55 = vector.extract_strided_slice %46 {offsets = [0, 64], sizes = [8, 32], strides = [1, 1]} : vector<8x128xf32> to vector<8x32xf32>
    %56 = math.tanh %55 : vector<8x32xf32>
    %57 = arith.mulf %53, %40 : vector<8x32xf32>
    %58 = arith.mulf %52, %56 : vector<8x32xf32>
    %59 = arith.addf %57, %58 : vector<8x32xf32>
    %60 = math.tanh %59 : vector<8x32xf32>
    %61 = arith.mulf %54, %60 : vector<8x32xf32>
    %c0_48 = arith.constant 0 : index
    %c0_49 = arith.constant 0 : index
    %c0_50 = arith.constant 0 : index
    %62 = vector.load %arg20[%c0_48, %c0_49, %c0_50] : memref<8x8x32xf32, #tpu.memory_space<vmem>>, vector<1x8x32xf32>
    %63 = vector.shape_cast %62 : vector<1x8x32xf32> to vector<8x32xf32>
    %64 = vector.shape_cast %61 : vector<8x32xf32> to vector<1x8x32xf32>
    tpu.vector_store %arg20[%c0_48, %c0_49, %c0_50], %64 {strides = array<i32>} : memref<8x8x32xf32, #tpu.memory_space<vmem>>, vector<1x8x32xf32>,
    %c0_51 = arith.constant 0 : index
    %c0_52 = arith.constant 0 : index
    %c0_53 = arith.constant 0 : index
    %65 = vector.load %arg21[%c0_51, %c0_52, %c0_53] : memref<8x8x32xf32, #tpu.memory_space<vmem>>, vector<1x8x32xf32>
    %66 = vector.shape_cast %65 : vector<1x8x32xf32> to vector<8x32xf32>
    %67 = vector.shape_cast %59 : vector<8x32xf32> to vector<1x8x32xf32>
    tpu.vector_store %arg21[%c0_51, %c0_52, %c0_53], %67 {strides = array<i32>} : memref<8x8x32xf32, #tpu.memory_space<vmem>>, vector<1x8x32xf32>,
    %c1 = arith.constant 1 : index
    %c0_54 = arith.constant 0 : index
    %c0_55 = arith.constant 0 : index
    %68 = vector.load %arg5[%c1, %c0_54, %c0_55] : memref<8x64x32xf32, #tpu.memory_space<vmem>>, vector<1x32x32xf32>
    %69 = vector.shape_cast %68 : vector<1x32x32xf32> to vector<32x32xf32>
    %c1_56 = arith.constant 1 : index
    %c0_57 = arith.constant 0 : index
    %c0_58 = arith.constant 0 : index
    %70 = vector.load %arg7[%c1_56, %c0_57, %c0_58] : memref<8x64x32xf32, #tpu.memory_space<vmem>>, vector<1x32x32xf32>
    %71 = vector.shape_cast %70 : vector<1x32x32xf32> to vector<32x32xf32>
    %cst_59 = arith.constant dense<0.000000e+00> : vector<8x32xf32>
    %72 = tpu.matmul %61, %69, %cst_59 {dimension_numbers = #tpu.dot_dimension_numbers<[1], [0], [0], [1], [0, 0, 1, 1], [], []>} : vector<8x32xf32>, vector<32x32xf32>, vector<8x32xf32> -> vector<8x32xf32>
    %73 = vector.extract_strided_slice %5 {offsets = [1, 0, 0], sizes = [1, 8, 32], strides = [1, 1, 1]} : vector<8x8x32xf32> to vector<1x8x32xf32>
    %74 = vector.shape_cast %73 : vector<1x8x32xf32> to vector<8x32xf32>
    %75 = arith.addf %72, %74 : vector<8x32xf32>
    %cst_60 = arith.constant 0.000000e+00 : f32
    %76 = vector.broadcast %cst_60 : f32 to vector<8x32xf32>
    %77 = arith.maximumf %75, %76 : vector<8x32xf32>
    %cst_61 = arith.constant dense<0.000000e+00> : vector<8x32xf32>
    %78 = tpu.matmul %59, %71, %cst_61 {dimension_numbers = #tpu.dot_dimension_numbers<[1], [0], [0], [1], [0, 0, 1, 1], [], []>} : vector<8x32xf32>, vector<32x32xf32>, vector<8x32xf32> -> vector<8x32xf32>
    %79 = vector.extract_strided_slice %11 {offsets = [1, 0, 0], sizes = [1, 8, 32], strides = [1, 1, 1]} : vector<8x8x32xf32> to vector<1x8x32xf32>
    %80 = vector.shape_cast %79 : vector<1x8x32xf32> to vector<8x32xf32>
    %81 = arith.addf %78, %80 : vector<8x32xf32>
    %cst_62 = arith.constant 0.000000e+00 : f32
    %82 = vector.broadcast %cst_62 : f32 to vector<8x32xf32>
    %83 = arith.maximumf %81, %82 : vector<8x32xf32>
    %84 = vector.extract_strided_slice %22 {offsets = [1, 0, 0], sizes = [1, 8, 128], strides = [1, 1, 1]} : vector<8x8x128xf32> to vector<1x8x128xf32>
    %85 = vector.shape_cast %84 : vector<1x8x128xf32> to vector<8x128xf32>
    %c1_63 = arith.constant 1 : index
    %c0_64 = arith.constant 0 : index
    %c0_65 = arith.constant 0 : index
    %86 = vector.load %arg11[%c1_63, %c0_64, %c0_65] : memref<8x32x128xf32, #tpu.memory_space<vmem>>, vector<1x32x128xf32>
    %87 = vector.shape_cast %86 : vector<1x32x128xf32> to vector<32x128xf32>
    %cst_66 = arith.constant dense<0.000000e+00> : vector<8x128xf32>
    %88 = tpu.matmul %77, %87, %cst_66 {dimension_numbers = #tpu.dot_dimension_numbers<[1], [0], [0], [1], [0, 0, 1, 1], [], []>} : vector<8x32xf32>, vector<32x128xf32>, vector<8x128xf32> -> vector<8x128xf32>
    %89 = arith.addf %85, %88 : vector<8x128xf32>
    %90 = arith.negf %89 : vector<8x128xf32>
    %91 = math.exp %90 : vector<8x128xf32>
    %cst_67 = arith.constant 1.000000e+00 : f32
    %92 = vector.broadcast %cst_67 : f32 to vector<8x128xf32>
    %93 = arith.addf %92, %91 : vector<8x128xf32>
    %94 = arith.divf %92, %93 : vector<8x128xf32>
    %95 = vector.extract_strided_slice %94 {offsets = [0, 0], sizes = [8, 32], strides = [1, 1]} : vector<8x128xf32> to vector<8x32xf32>
    %96 = vector.extract_strided_slice %94 {offsets = [0, 32], sizes = [8, 32], strides = [1, 1]} : vector<8x128xf32> to vector<8x32xf32>
    %97 = vector.extract_strided_slice %94 {offsets = [0, 96], sizes = [8, 32], strides = [1, 1]} : vector<8x128xf32> to vector<8x32xf32>
    %98 = vector.extract_strided_slice %89 {offsets = [0, 64], sizes = [8, 32], strides = [1, 1]} : vector<8x128xf32> to vector<8x32xf32>
    %99 = math.tanh %98 : vector<8x32xf32>
    %100 = arith.mulf %96, %83 : vector<8x32xf32>
    %101 = arith.mulf %95, %99 : vector<8x32xf32>
    %102 = arith.addf %100, %101 : vector<8x32xf32>
    %103 = math.tanh %102 : vector<8x32xf32>
    %104 = arith.mulf %97, %103 : vector<8x32xf32>
    %c1_68 = arith.constant 1 : index
    %c0_69 = arith.constant 0 : index
    %c0_70 = arith.constant 0 : index
    %105 = vector.load %arg20[%c1_68, %c0_69, %c0_70] : memref<8x8x32xf32, #tpu.memory_space<vmem>>, vector<1x8x32xf32>
    %106 = vector.shape_cast %105 : vector<1x8x32xf32> to vector<8x32xf32>
    %107 = vector.shape_cast %104 : vector<8x32xf32> to vector<1x8x32xf32>
    tpu.vector_store %arg20[%c1_68, %c0_69, %c0_70], %107 {strides = array<i32>} : memref<8x8x32xf32, #tpu.memory_space<vmem>>, vector<1x8x32xf32>,
    %c1_71 = arith.constant 1 : index
    %c0_72 = arith.constant 0 : index
    %c0_73 = arith.constant 0 : index
    %108 = vector.load %arg21[%c1_71, %c0_72, %c0_73] : memref<8x8x32xf32, #tpu.memory_space<vmem>>, vector<1x8x32xf32>
    %109 = vector.shape_cast %108 : vector<1x8x32xf32> to vector<8x32xf32>
    %110 = vector.shape_cast %102 : vector<8x32xf32> to vector<1x8x32xf32>
    tpu.vector_store %arg21[%c1_71, %c0_72, %c0_73], %110 {strides = array<i32>} : memref<8x8x32xf32, #tpu.memory_space<vmem>>, vector<1x8x32xf32>,
    %c2 = arith.constant 2 : index
    %c0_74 = arith.constant 0 : index
    %c0_75 = arith.constant 0 : index
    %111 = vector.load %arg5[%c2, %c0_74, %c0_75] : memref<8x64x32xf32, #tpu.memory_space<vmem>>, vector<1x32x32xf32>
    %112 = vector.shape_cast %111 : vector<1x32x32xf32> to vector<32x32xf32>
    %c2_76 = arith.constant 2 : index
    %c0_77 = arith.constant 0 : index
    %c0_78 = arith.constant 0 : index
    %113 = vector.load %arg7[%c2_76, %c0_77, %c0_78] : memref<8x64x32xf32, #tpu.memory_space<vmem>>, vector<1x32x32xf32>
    %114 = vector.shape_cast %113 : vector<1x32x32xf32> to vector<32x32xf32>
    %cst_79 = arith.constant dense<0.000000e+00> : vector<8x32xf32>
    %115 = tpu.matmul %104, %112, %cst_79 {dimension_numbers = #tpu.dot_dimension_numbers<[1], [0], [0], [1], [0, 0, 1, 1], [], []>} : vector<8x32xf32>, vector<32x32xf32>, vector<8x32xf32> -> vector<8x32xf32>
    %116 = vector.extract_strided_slice %5 {offsets = [2, 0, 0], sizes = [1, 8, 32], strides = [1, 1, 1]} : vector<8x8x32xf32> to vector<1x8x32xf32>
    %117 = vector.shape_cast %116 : vector<1x8x32xf32> to vector<8x32xf32>
    %118 = arith.addf %115, %117 : vector<8x32xf32>
    %cst_80 = arith.constant 0.000000e+00 : f32
    %119 = vector.broadcast %cst_80 : f32 to vector<8x32xf32>
    %120 = arith.maximumf %118, %119 : vector<8x32xf32>
    %cst_81 = arith.constant dense<0.000000e+00> : vector<8x32xf32>
    %121 = tpu.matmul %102, %114, %cst_81 {dimension_numbers = #tpu.dot_dimension_numbers<[1], [0], [0], [1], [0, 0, 1, 1], [], []>} : vector<8x32xf32>, vector<32x32xf32>, vector<8x32xf32> -> vector<8x32xf32>
    %122 = vector.extract_strided_slice %11 {offsets = [2, 0, 0], sizes = [1, 8, 32], strides = [1, 1, 1]} : vector<8x8x32xf32> to vector<1x8x32xf32>
    %123 = vector.shape_cast %122 : vector<1x8x32xf32> to vector<8x32xf32>
    %124 = arith.addf %121, %123 : vector<8x32xf32>
    %cst_82 = arith.constant 0.000000e+00 : f32
    %125 = vector.broadcast %cst_82 : f32 to vector<8x32xf32>
    %126 = arith.maximumf %124, %125 : vector<8x32xf32>
    %127 = vector.extract_strided_slice %22 {offsets = [2, 0, 0], sizes = [1, 8, 128], strides = [1, 1, 1]} : vector<8x8x128xf32> to vector<1x8x128xf32>
    %128 = vector.shape_cast %127 : vector<1x8x128xf32> to vector<8x128xf32>
    %c2_83 = arith.constant 2 : index
    %c0_84 = arith.constant 0 : index
    %c0_85 = arith.constant 0 : index
    %129 = vector.load %arg11[%c2_83, %c0_84, %c0_85] : memref<8x32x128xf32, #tpu.memory_space<vmem>>, vector<1x32x128xf32>
    %130 = vector.shape_cast %129 : vector<1x32x128xf32> to vector<32x128xf32>
    %cst_86 = arith.constant dense<0.000000e+00> : vector<8x128xf32>
    %131 = tpu.matmul %120, %130, %cst_86 {dimension_numbers = #tpu.dot_dimension_numbers<[1], [0], [0], [1], [0, 0, 1, 1], [], []>} : vector<8x32xf32>, vector<32x128xf32>, vector<8x128xf32> -> vector<8x128xf32>
    %132 = arith.addf %128, %131 : vector<8x128xf32>
    %133 = arith.negf %132 : vector<8x128xf32>
    %134 = math.exp %133 : vector<8x128xf32>
    %cst_87 = arith.constant 1.000000e+00 : f32
    %135 = vector.broadcast %cst_87 : f32 to vector<8x128xf32>
    %136 = arith.addf %135, %134 : vector<8x128xf32>
    %137 = arith.divf %135, %136 : vector<8x128xf32>
    %138 = vector.extract_strided_slice %137 {offsets = [0, 0], sizes = [8, 32], strides = [1, 1]} : vector<8x128xf32> to vector<8x32xf32>
    %139 = vector.extract_strided_slice %137 {offsets = [0, 32], sizes = [8, 32], strides = [1, 1]} : vector<8x128xf32> to vector<8x32xf32>
    %140 = vector.extract_strided_slice %137 {offsets = [0, 96], sizes = [8, 32], strides = [1, 1]} : vector<8x128xf32> to vector<8x32xf32>
    %141 = vector.extract_strided_slice %132 {offsets = [0, 64], sizes = [8, 32], strides = [1, 1]} : vector<8x128xf32> to vector<8x32xf32>
    %142 = math.tanh %141 : vector<8x32xf32>
    %143 = arith.mulf %139, %126 : vector<8x32xf32>
    %144 = arith.mulf %138, %142 : vector<8x32xf32>
    %145 = arith.addf %143, %144 : vector<8x32xf32>
    %146 = math.tanh %145 : vector<8x32xf32>
    %147 = arith.mulf %140, %146 : vector<8x32xf32>
    %c2_88 = arith.constant 2 : index
    %c0_89 = arith.constant 0 : index
    %c0_90 = arith.constant 0 : index
    %148 = vector.load %arg20[%c2_88, %c0_89, %c0_90] : memref<8x8x32xf32, #tpu.memory_space<vmem>>, vector<1x8x32xf32>
    %149 = vector.shape_cast %148 : vector<1x8x32xf32> to vector<8x32xf32>
    %150 = vector.shape_cast %147 : vector<8x32xf32> to vector<1x8x32xf32>
    tpu.vector_store %arg20[%c2_88, %c0_89, %c0_90], %150 {strides = array<i32>} : memref<8x8x32xf32, #tpu.memory_space<vmem>>, vector<1x8x32xf32>,
    %c2_91 = arith.constant 2 : index
    %c0_92 = arith.constant 0 : index
    %c0_93 = arith.constant 0 : index
    %151 = vector.load %arg21[%c2_91, %c0_92, %c0_93] : memref<8x8x32xf32, #tpu.memory_space<vmem>>, vector<1x8x32xf32>
    %152 = vector.shape_cast %151 : vector<1x8x32xf32> to vector<8x32xf32>
    %153 = vector.shape_cast %145 : vector<8x32xf32> to vector<1x8x32xf32>
    tpu.vector_store %arg21[%c2_91, %c0_92, %c0_93], %153 {strides = array<i32>} : memref<8x8x32xf32, #tpu.memory_space<vmem>>, vector<1x8x32xf32>,
    %c3 = arith.constant 3 : index
    %c0_94 = arith.constant 0 : index
    %c0_95 = arith.constant 0 : index
    %154 = vector.load %arg5[%c3, %c0_94, %c0_95] : memref<8x64x32xf32, #tpu.memory_space<vmem>>, vector<1x32x32xf32>
    %155 = vector.shape_cast %154 : vector<1x32x32xf32> to vector<32x32xf32>
    %c3_96 = arith.constant 3 : index
    %c0_97 = arith.constant 0 : index
    %c0_98 = arith.constant 0 : index
    %156 = vector.load %arg7[%c3_96, %c0_97, %c0_98] : memref<8x64x32xf32, #tpu.memory_space<vmem>>, vector<1x32x32xf32>
    %157 = vector.shape_cast %156 : vector<1x32x32xf32> to vector<32x32xf32>
    %cst_99 = arith.constant dense<0.000000e+00> : vector<8x32xf32>
    %158 = tpu.matmul %147, %155, %cst_99 {dimension_numbers = #tpu.dot_dimension_numbers<[1], [0], [0], [1], [0, 0, 1, 1], [], []>} : vector<8x32xf32>, vector<32x32xf32>, vector<8x32xf32> -> vector<8x32xf32>
    %159 = vector.extract_strided_slice %5 {offsets = [3, 0, 0], sizes = [1, 8, 32], strides = [1, 1, 1]} : vector<8x8x32xf32> to vector<1x8x32xf32>
    %160 = vector.shape_cast %159 : vector<1x8x32xf32> to vector<8x32xf32>
    %161 = arith.addf %158, %160 : vector<8x32xf32>
    %cst_100 = arith.constant 0.000000e+00 : f32
    %162 = vector.broadcast %cst_100 : f32 to vector<8x32xf32>
    %163 = arith.maximumf %161, %162 : vector<8x32xf32>
    %cst_101 = arith.constant dense<0.000000e+00> : vector<8x32xf32>
    %164 = tpu.matmul %145, %157, %cst_101 {dimension_numbers = #tpu.dot_dimension_numbers<[1], [0], [0], [1], [0, 0, 1, 1], [], []>} : vector<8x32xf32>, vector<32x32xf32>, vector<8x32xf32> -> vector<8x32xf32>
    %165 = vector.extract_strided_slice %11 {offsets = [3, 0, 0], sizes = [1, 8, 32], strides = [1, 1, 1]} : vector<8x8x32xf32> to vector<1x8x32xf32>
    %166 = vector.shape_cast %165 : vector<1x8x32xf32> to vector<8x32xf32>
    %167 = arith.addf %164, %166 : vector<8x32xf32>
    %cst_102 = arith.constant 0.000000e+00 : f32
    %168 = vector.broadcast %cst_102 : f32 to vector<8x32xf32>
    %169 = arith.maximumf %167, %168 : vector<8x32xf32>
    %170 = vector.extract_strided_slice %22 {offsets = [3, 0, 0], sizes = [1, 8, 128], strides = [1, 1, 1]} : vector<8x8x128xf32> to vector<1x8x128xf32>
    %171 = vector.shape_cast %170 : vector<1x8x128xf32> to vector<8x128xf32>
    %c3_103 = arith.constant 3 : index
    %c0_104 = arith.constant 0 : index
    %c0_105 = arith.constant 0 : index
    %172 = vector.load %arg11[%c3_103, %c0_104, %c0_105] : memref<8x32x128xf32, #tpu.memory_space<vmem>>, vector<1x32x128xf32>
    %173 = vector.shape_cast %172 : vector<1x32x128xf32> to vector<32x128xf32>
    %cst_106 = arith.constant dense<0.000000e+00> : vector<8x128xf32>
    %174 = tpu.matmul %163, %173, %cst_106 {dimension_numbers = #tpu.dot_dimension_numbers<[1], [0], [0], [1], [0, 0, 1, 1], [], []>} : vector<8x32xf32>, vector<32x128xf32>, vector<8x128xf32> -> vector<8x128xf32>
    %175 = arith.addf %171, %174 : vector<8x128xf32>
    %176 = arith.negf %175 : vector<8x128xf32>
    %177 = math.exp %176 : vector<8x128xf32>
    %cst_107 = arith.constant 1.000000e+00 : f32
    %178 = vector.broadcast %cst_107 : f32 to vector<8x128xf32>
    %179 = arith.addf %178, %177 : vector<8x128xf32>
    %180 = arith.divf %178, %179 : vector<8x128xf32>
    %181 = vector.extract_strided_slice %180 {offsets = [0, 0], sizes = [8, 32], strides = [1, 1]} : vector<8x128xf32> to vector<8x32xf32>
    %182 = vector.extract_strided_slice %180 {offsets = [0, 32], sizes = [8, 32], strides = [1, 1]} : vector<8x128xf32> to vector<8x32xf32>
    %183 = vector.extract_strided_slice %180 {offsets = [0, 96], sizes = [8, 32], strides = [1, 1]} : vector<8x128xf32> to vector<8x32xf32>
    %184 = vector.extract_strided_slice %175 {offsets = [0, 64], sizes = [8, 32], strides = [1, 1]} : vector<8x128xf32> to vector<8x32xf32>
    %185 = math.tanh %184 : vector<8x32xf32>
    %186 = arith.mulf %182, %169 : vector<8x32xf32>
    %187 = arith.mulf %181, %185 : vector<8x32xf32>
    %188 = arith.addf %186, %187 : vector<8x32xf32>
    %189 = math.tanh %188 : vector<8x32xf32>
    %190 = arith.mulf %183, %189 : vector<8x32xf32>
    %c3_108 = arith.constant 3 : index
    %c0_109 = arith.constant 0 : index
    %c0_110 = arith.constant 0 : index
    %191 = vector.load %arg20[%c3_108, %c0_109, %c0_110] : memref<8x8x32xf32, #tpu.memory_space<vmem>>, vector<1x8x32xf32>
    %192 = vector.shape_cast %191 : vector<1x8x32xf32> to vector<8x32xf32>
    %193 = vector.shape_cast %190 : vector<8x32xf32> to vector<1x8x32xf32>
    tpu.vector_store %arg20[%c3_108, %c0_109, %c0_110], %193 {strides = array<i32>} : memref<8x8x32xf32, #tpu.memory_space<vmem>>, vector<1x8x32xf32>,
    %c3_111 = arith.constant 3 : index
    %c0_112 = arith.constant 0 : index
    %c0_113 = arith.constant 0 : index
    %194 = vector.load %arg21[%c3_111, %c0_112, %c0_113] : memref<8x8x32xf32, #tpu.memory_space<vmem>>, vector<1x8x32xf32>
    %195 = vector.shape_cast %194 : vector<1x8x32xf32> to vector<8x32xf32>
    %196 = vector.shape_cast %188 : vector<8x32xf32> to vector<1x8x32xf32>
    tpu.vector_store %arg21[%c3_111, %c0_112, %c0_113], %196 {strides = array<i32>} : memref<8x8x32xf32, #tpu.memory_space<vmem>>, vector<1x8x32xf32>,
    %c4 = arith.constant 4 : index
    %c0_114 = arith.constant 0 : index
    %c0_115 = arith.constant 0 : index
    %197 = vector.load %arg5[%c4, %c0_114, %c0_115] : memref<8x64x32xf32, #tpu.memory_space<vmem>>, vector<1x32x32xf32>
    %198 = vector.shape_cast %197 : vector<1x32x32xf32> to vector<32x32xf32>
    %c4_116 = arith.constant 4 : index
    %c0_117 = arith.constant 0 : index
    %c0_118 = arith.constant 0 : index
    %199 = vector.load %arg7[%c4_116, %c0_117, %c0_118] : memref<8x64x32xf32, #tpu.memory_space<vmem>>, vector<1x32x32xf32>
    %200 = vector.shape_cast %199 : vector<1x32x32xf32> to vector<32x32xf32>
    %cst_119 = arith.constant dense<0.000000e+00> : vector<8x32xf32>
    %201 = tpu.matmul %190, %198, %cst_119 {dimension_numbers = #tpu.dot_dimension_numbers<[1], [0], [0], [1], [0, 0, 1, 1], [], []>} : vector<8x32xf32>, vector<32x32xf32>, vector<8x32xf32> -> vector<8x32xf32>
    %202 = vector.extract_strided_slice %5 {offsets = [4, 0, 0], sizes = [1, 8, 32], strides = [1, 1, 1]} : vector<8x8x32xf32> to vector<1x8x32xf32>
    %203 = vector.shape_cast %202 : vector<1x8x32xf32> to vector<8x32xf32>
    %204 = arith.addf %201, %203 : vector<8x32xf32>
    %cst_120 = arith.constant 0.000000e+00 : f32
    %205 = vector.broadcast %cst_120 : f32 to vector<8x32xf32>
    %206 = arith.maximumf %204, %205 : vector<8x32xf32>
    %cst_121 = arith.constant dense<0.000000e+00> : vector<8x32xf32>
    %207 = tpu.matmul %188, %200, %cst_121 {dimension_numbers = #tpu.dot_dimension_numbers<[1], [0], [0], [1], [0, 0, 1, 1], [], []>} : vector<8x32xf32>, vector<32x32xf32>, vector<8x32xf32> -> vector<8x32xf32>
    %208 = vector.extract_strided_slice %11 {offsets = [4, 0, 0], sizes = [1, 8, 32], strides = [1, 1, 1]} : vector<8x8x32xf32> to vector<1x8x32xf32>
    %209 = vector.shape_cast %208 : vector<1x8x32xf32> to vector<8x32xf32>
    %210 = arith.addf %207, %209 : vector<8x32xf32>
    %cst_122 = arith.constant 0.000000e+00 : f32
    %211 = vector.broadcast %cst_122 : f32 to vector<8x32xf32>
    %212 = arith.maximumf %210, %211 : vector<8x32xf32>
    %213 = vector.extract_strided_slice %22 {offsets = [4, 0, 0], sizes = [1, 8, 128], strides = [1, 1, 1]} : vector<8x8x128xf32> to vector<1x8x128xf32>
    %214 = vector.shape_cast %213 : vector<1x8x128xf32> to vector<8x128xf32>
    %c4_123 = arith.constant 4 : index
    %c0_124 = arith.constant 0 : index
    %c0_125 = arith.constant 0 : index
    %215 = vector.load %arg11[%c4_123, %c0_124, %c0_125] : memref<8x32x128xf32, #tpu.memory_space<vmem>>, vector<1x32x128xf32>
    %216 = vector.shape_cast %215 : vector<1x32x128xf32> to vector<32x128xf32>
    %cst_126 = arith.constant dense<0.000000e+00> : vector<8x128xf32>
    %217 = tpu.matmul %206, %216, %cst_126 {dimension_numbers = #tpu.dot_dimension_numbers<[1], [0], [0], [1], [0, 0, 1, 1], [], []>} : vector<8x32xf32>, vector<32x128xf32>, vector<8x128xf32> -> vector<8x128xf32>
    %218 = arith.addf %214, %217 : vector<8x128xf32>
    %219 = arith.negf %218 : vector<8x128xf32>
    %220 = math.exp %219 : vector<8x128xf32>
    %cst_127 = arith.constant 1.000000e+00 : f32
    %221 = vector.broadcast %cst_127 : f32 to vector<8x128xf32>
    %222 = arith.addf %221, %220 : vector<8x128xf32>
    %223 = arith.divf %221, %222 : vector<8x128xf32>
    %224 = vector.extract_strided_slice %223 {offsets = [0, 0], sizes = [8, 32], strides = [1, 1]} : vector<8x128xf32> to vector<8x32xf32>
    %225 = vector.extract_strided_slice %223 {offsets = [0, 32], sizes = [8, 32], strides = [1, 1]} : vector<8x128xf32> to vector<8x32xf32>
    %226 = vector.extract_strided_slice %223 {offsets = [0, 96], sizes = [8, 32], strides = [1, 1]} : vector<8x128xf32> to vector<8x32xf32>
    %227 = vector.extract_strided_slice %218 {offsets = [0, 64], sizes = [8, 32], strides = [1, 1]} : vector<8x128xf32> to vector<8x32xf32>
    %228 = math.tanh %227 : vector<8x32xf32>
    %229 = arith.mulf %225, %212 : vector<8x32xf32>
    %230 = arith.mulf %224, %228 : vector<8x32xf32>
    %231 = arith.addf %229, %230 : vector<8x32xf32>
    %232 = math.tanh %231 : vector<8x32xf32>
    %233 = arith.mulf %226, %232 : vector<8x32xf32>
    %c4_128 = arith.constant 4 : index
    %c0_129 = arith.constant 0 : index
    %c0_130 = arith.constant 0 : index
    %234 = vector.load %arg20[%c4_128, %c0_129, %c0_130] : memref<8x8x32xf32, #tpu.memory_space<vmem>>, vector<1x8x32xf32>
    %235 = vector.shape_cast %234 : vector<1x8x32xf32> to vector<8x32xf32>
    %236 = vector.shape_cast %233 : vector<8x32xf32> to vector<1x8x32xf32>
    tpu.vector_store %arg20[%c4_128, %c0_129, %c0_130], %236 {strides = array<i32>} : memref<8x8x32xf32, #tpu.memory_space<vmem>>, vector<1x8x32xf32>,
    %c4_131 = arith.constant 4 : index
    %c0_132 = arith.constant 0 : index
    %c0_133 = arith.constant 0 : index
    %237 = vector.load %arg21[%c4_131, %c0_132, %c0_133] : memref<8x8x32xf32, #tpu.memory_space<vmem>>, vector<1x8x32xf32>
    %238 = vector.shape_cast %237 : vector<1x8x32xf32> to vector<8x32xf32>
    %239 = vector.shape_cast %231 : vector<8x32xf32> to vector<1x8x32xf32>
    tpu.vector_store %arg21[%c4_131, %c0_132, %c0_133], %239 {strides = array<i32>} : memref<8x8x32xf32, #tpu.memory_space<vmem>>, vector<1x8x32xf32>,
    %c5 = arith.constant 5 : index
    %c0_134 = arith.constant 0 : index
    %c0_135 = arith.constant 0 : index
    %240 = vector.load %arg5[%c5, %c0_134, %c0_135] : memref<8x64x32xf32, #tpu.memory_space<vmem>>, vector<1x32x32xf32>
    %241 = vector.shape_cast %240 : vector<1x32x32xf32> to vector<32x32xf32>
    %c5_136 = arith.constant 5 : index
    %c0_137 = arith.constant 0 : index
    %c0_138 = arith.constant 0 : index
    %242 = vector.load %arg7[%c5_136, %c0_137, %c0_138] : memref<8x64x32xf32, #tpu.memory_space<vmem>>, vector<1x32x32xf32>
    %243 = vector.shape_cast %242 : vector<1x32x32xf32> to vector<32x32xf32>
    %cst_139 = arith.constant dense<0.000000e+00> : vector<8x32xf32>
    %244 = tpu.matmul %233, %241, %cst_139 {dimension_numbers = #tpu.dot_dimension_numbers<[1], [0], [0], [1], [0, 0, 1, 1], [], []>} : vector<8x32xf32>, vector<32x32xf32>, vector<8x32xf32> -> vector<8x32xf32>
    %245 = vector.extract_strided_slice %5 {offsets = [5, 0, 0], sizes = [1, 8, 32], strides = [1, 1, 1]} : vector<8x8x32xf32> to vector<1x8x32xf32>
    %246 = vector.shape_cast %245 : vector<1x8x32xf32> to vector<8x32xf32>
    %247 = arith.addf %244, %246 : vector<8x32xf32>
    %cst_140 = arith.constant 0.000000e+00 : f32
    %248 = vector.broadcast %cst_140 : f32 to vector<8x32xf32>
    %249 = arith.maximumf %247, %248 : vector<8x32xf32>
    %cst_141 = arith.constant dense<0.000000e+00> : vector<8x32xf32>
    %250 = tpu.matmul %231, %243, %cst_141 {dimension_numbers = #tpu.dot_dimension_numbers<[1], [0], [0], [1], [0, 0, 1, 1], [], []>} : vector<8x32xf32>, vector<32x32xf32>, vector<8x32xf32> -> vector<8x32xf32>
    %251 = vector.extract_strided_slice %11 {offsets = [5, 0, 0], sizes = [1, 8, 32], strides = [1, 1, 1]} : vector<8x8x32xf32> to vector<1x8x32xf32>
    %252 = vector.shape_cast %251 : vector<1x8x32xf32> to vector<8x32xf32>
    %253 = arith.addf %250, %252 : vector<8x32xf32>
    %cst_142 = arith.constant 0.000000e+00 : f32
    %254 = vector.broadcast %cst_142 : f32 to vector<8x32xf32>
    %255 = arith.maximumf %253, %254 : vector<8x32xf32>
    %256 = vector.extract_strided_slice %22 {offsets = [5, 0, 0], sizes = [1, 8, 128], strides = [1, 1, 1]} : vector<8x8x128xf32> to vector<1x8x128xf32>
    %257 = vector.shape_cast %256 : vector<1x8x128xf32> to vector<8x128xf32>
    %c5_143 = arith.constant 5 : index
    %c0_144 = arith.constant 0 : index
    %c0_145 = arith.constant 0 : index
    %258 = vector.load %arg11[%c5_143, %c0_144, %c0_145] : memref<8x32x128xf32, #tpu.memory_space<vmem>>, vector<1x32x128xf32>
    %259 = vector.shape_cast %258 : vector<1x32x128xf32> to vector<32x128xf32>
    %cst_146 = arith.constant dense<0.000000e+00> : vector<8x128xf32>
    %260 = tpu.matmul %249, %259, %cst_146 {dimension_numbers = #tpu.dot_dimension_numbers<[1], [0], [0], [1], [0, 0, 1, 1], [], []>} : vector<8x32xf32>, vector<32x128xf32>, vector<8x128xf32> -> vector<8x128xf32>
    %261 = arith.addf %257, %260 : vector<8x128xf32>
    %262 = arith.negf %261 : vector<8x128xf32>
    %263 = math.exp %262 : vector<8x128xf32>
    %cst_147 = arith.constant 1.000000e+00 : f32
    %264 = vector.broadcast %cst_147 : f32 to vector<8x128xf32>
    %265 = arith.addf %264, %263 : vector<8x128xf32>
    %266 = arith.divf %264, %265 : vector<8x128xf32>
    %267 = vector.extract_strided_slice %266 {offsets = [0, 0], sizes = [8, 32], strides = [1, 1]} : vector<8x128xf32> to vector<8x32xf32>
    %268 = vector.extract_strided_slice %266 {offsets = [0, 32], sizes = [8, 32], strides = [1, 1]} : vector<8x128xf32> to vector<8x32xf32>
    %269 = vector.extract_strided_slice %266 {offsets = [0, 96], sizes = [8, 32], strides = [1, 1]} : vector<8x128xf32> to vector<8x32xf32>
    %270 = vector.extract_strided_slice %261 {offsets = [0, 64], sizes = [8, 32], strides = [1, 1]} : vector<8x128xf32> to vector<8x32xf32>
    %271 = math.tanh %270 : vector<8x32xf32>
    %272 = arith.mulf %268, %255 : vector<8x32xf32>
    %273 = arith.mulf %267, %271 : vector<8x32xf32>
    %274 = arith.addf %272, %273 : vector<8x32xf32>
    %275 = math.tanh %274 : vector<8x32xf32>
    %276 = arith.mulf %269, %275 : vector<8x32xf32>
    %c5_148 = arith.constant 5 : index
    %c0_149 = arith.constant 0 : index
    %c0_150 = arith.constant 0 : index
    %277 = vector.load %arg20[%c5_148, %c0_149, %c0_150] : memref<8x8x32xf32, #tpu.memory_space<vmem>>, vector<1x8x32xf32>
    %278 = vector.shape_cast %277 : vector<1x8x32xf32> to vector<8x32xf32>
    %279 = vector.shape_cast %276 : vector<8x32xf32> to vector<1x8x32xf32>
    tpu.vector_store %arg20[%c5_148, %c0_149, %c0_150], %279 {strides = array<i32>} : memref<8x8x32xf32, #tpu.memory_space<vmem>>, vector<1x8x32xf32>,
    %c5_151 = arith.constant 5 : index
    %c0_152 = arith.constant 0 : index
    %c0_153 = arith.constant 0 : index
    %280 = vector.load %arg21[%c5_151, %c0_152, %c0_153] : memref<8x8x32xf32, #tpu.memory_space<vmem>>, vector<1x8x32xf32>
    %281 = vector.shape_cast %280 : vector<1x8x32xf32> to vector<8x32xf32>
    %282 = vector.shape_cast %274 : vector<8x32xf32> to vector<1x8x32xf32>
    tpu.vector_store %arg21[%c5_151, %c0_152, %c0_153], %282 {strides = array<i32>} : memref<8x8x32xf32, #tpu.memory_space<vmem>>, vector<1x8x32xf32>,
    %c6 = arith.constant 6 : index
    %c0_154 = arith.constant 0 : index
    %c0_155 = arith.constant 0 : index
    %283 = vector.load %arg5[%c6, %c0_154, %c0_155] : memref<8x64x32xf32, #tpu.memory_space<vmem>>, vector<1x32x32xf32>
    %284 = vector.shape_cast %283 : vector<1x32x32xf32> to vector<32x32xf32>
    %c6_156 = arith.constant 6 : index
    %c0_157 = arith.constant 0 : index
    %c0_158 = arith.constant 0 : index
    %285 = vector.load %arg7[%c6_156, %c0_157, %c0_158] : memref<8x64x32xf32, #tpu.memory_space<vmem>>, vector<1x32x32xf32>
    %286 = vector.shape_cast %285 : vector<1x32x32xf32> to vector<32x32xf32>
    %cst_159 = arith.constant dense<0.000000e+00> : vector<8x32xf32>
    %287 = tpu.matmul %276, %284, %cst_159 {dimension_numbers = #tpu.dot_dimension_numbers<[1], [0], [0], [1], [0, 0, 1, 1], [], []>} : vector<8x32xf32>, vector<32x32xf32>, vector<8x32xf32> -> vector<8x32xf32>
    %288 = vector.extract_strided_slice %5 {offsets = [6, 0, 0], sizes = [1, 8, 32], strides = [1, 1, 1]} : vector<8x8x32xf32> to vector<1x8x32xf32>
    %289 = vector.shape_cast %288 : vector<1x8x32xf32> to vector<8x32xf32>
    %290 = arith.addf %287, %289 : vector<8x32xf32>
    %cst_160 = arith.constant 0.000000e+00 : f32
    %291 = vector.broadcast %cst_160 : f32 to vector<8x32xf32>
    %292 = arith.maximumf %290, %291 : vector<8x32xf32>
    %cst_161 = arith.constant dense<0.000000e+00> : vector<8x32xf32>
    %293 = tpu.matmul %274, %286, %cst_161 {dimension_numbers = #tpu.dot_dimension_numbers<[1], [0], [0], [1], [0, 0, 1, 1], [], []>} : vector<8x32xf32>, vector<32x32xf32>, vector<8x32xf32> -> vector<8x32xf32>
    %294 = vector.extract_strided_slice %11 {offsets = [6, 0, 0], sizes = [1, 8, 32], strides = [1, 1, 1]} : vector<8x8x32xf32> to vector<1x8x32xf32>
    %295 = vector.shape_cast %294 : vector<1x8x32xf32> to vector<8x32xf32>
    %296 = arith.addf %293, %295 : vector<8x32xf32>
    %cst_162 = arith.constant 0.000000e+00 : f32
    %297 = vector.broadcast %cst_162 : f32 to vector<8x32xf32>
    %298 = arith.maximumf %296, %297 : vector<8x32xf32>
    %299 = vector.extract_strided_slice %22 {offsets = [6, 0, 0], sizes = [1, 8, 128], strides = [1, 1, 1]} : vector<8x8x128xf32> to vector<1x8x128xf32>
    %300 = vector.shape_cast %299 : vector<1x8x128xf32> to vector<8x128xf32>
    %c6_163 = arith.constant 6 : index
    %c0_164 = arith.constant 0 : index
    %c0_165 = arith.constant 0 : index
    %301 = vector.load %arg11[%c6_163, %c0_164, %c0_165] : memref<8x32x128xf32, #tpu.memory_space<vmem>>, vector<1x32x128xf32>
    %302 = vector.shape_cast %301 : vector<1x32x128xf32> to vector<32x128xf32>
    %cst_166 = arith.constant dense<0.000000e+00> : vector<8x128xf32>
    %303 = tpu.matmul %292, %302, %cst_166 {dimension_numbers = #tpu.dot_dimension_numbers<[1], [0], [0], [1], [0, 0, 1, 1], [], []>} : vector<8x32xf32>, vector<32x128xf32>, vector<8x128xf32> -> vector<8x128xf32>
    %304 = arith.addf %300, %303 : vector<8x128xf32>
    %305 = arith.negf %304 : vector<8x128xf32>
    %306 = math.exp %305 : vector<8x128xf32>
    %cst_167 = arith.constant 1.000000e+00 : f32
    %307 = vector.broadcast %cst_167 : f32 to vector<8x128xf32>
    %308 = arith.addf %307, %306 : vector<8x128xf32>
    %309 = arith.divf %307, %308 : vector<8x128xf32>
    %310 = vector.extract_strided_slice %309 {offsets = [0, 0], sizes = [8, 32], strides = [1, 1]} : vector<8x128xf32> to vector<8x32xf32>
    %311 = vector.extract_strided_slice %309 {offsets = [0, 32], sizes = [8, 32], strides = [1, 1]} : vector<8x128xf32> to vector<8x32xf32>
    %312 = vector.extract_strided_slice %309 {offsets = [0, 96], sizes = [8, 32], strides = [1, 1]} : vector<8x128xf32> to vector<8x32xf32>
    %313 = vector.extract_strided_slice %304 {offsets = [0, 64], sizes = [8, 32], strides = [1, 1]} : vector<8x128xf32> to vector<8x32xf32>
    %314 = math.tanh %313 : vector<8x32xf32>
    %315 = arith.mulf %311, %298 : vector<8x32xf32>
    %316 = arith.mulf %310, %314 : vector<8x32xf32>
    %317 = arith.addf %315, %316 : vector<8x32xf32>
    %318 = math.tanh %317 : vector<8x32xf32>
    %319 = arith.mulf %312, %318 : vector<8x32xf32>
    %c6_168 = arith.constant 6 : index
    %c0_169 = arith.constant 0 : index
    %c0_170 = arith.constant 0 : index
    %320 = vector.load %arg20[%c6_168, %c0_169, %c0_170] : memref<8x8x32xf32, #tpu.memory_space<vmem>>, vector<1x8x32xf32>
    %321 = vector.shape_cast %320 : vector<1x8x32xf32> to vector<8x32xf32>
    %322 = vector.shape_cast %319 : vector<8x32xf32> to vector<1x8x32xf32>
    tpu.vector_store %arg20[%c6_168, %c0_169, %c0_170], %322 {strides = array<i32>} : memref<8x8x32xf32, #tpu.memory_space<vmem>>, vector<1x8x32xf32>,
    %c6_171 = arith.constant 6 : index
    %c0_172 = arith.constant 0 : index
    %c0_173 = arith.constant 0 : index
    %323 = vector.load %arg21[%c6_171, %c0_172, %c0_173] : memref<8x8x32xf32, #tpu.memory_space<vmem>>, vector<1x8x32xf32>
    %324 = vector.shape_cast %323 : vector<1x8x32xf32> to vector<8x32xf32>
    %325 = vector.shape_cast %317 : vector<8x32xf32> to vector<1x8x32xf32>
    tpu.vector_store %arg21[%c6_171, %c0_172, %c0_173], %325 {strides = array<i32>} : memref<8x8x32xf32, #tpu.memory_space<vmem>>, vector<1x8x32xf32>,
    %c7 = arith.constant 7 : index
    %c0_174 = arith.constant 0 : index
    %c0_175 = arith.constant 0 : index
    %326 = vector.load %arg5[%c7, %c0_174, %c0_175] : memref<8x64x32xf32, #tpu.memory_space<vmem>>, vector<1x32x32xf32>
    %327 = vector.shape_cast %326 : vector<1x32x32xf32> to vector<32x32xf32>
    %c7_176 = arith.constant 7 : index
    %c0_177 = arith.constant 0 : index
    %c0_178 = arith.constant 0 : index
    %328 = vector.load %arg7[%c7_176, %c0_177, %c0_178] : memref<8x64x32xf32, #tpu.memory_space<vmem>>, vector<1x32x32xf32>
    %329 = vector.shape_cast %328 : vector<1x32x32xf32> to vector<32x32xf32>
    %cst_179 = arith.constant dense<0.000000e+00> : vector<8x32xf32>
    %330 = tpu.matmul %319, %327, %cst_179 {dimension_numbers = #tpu.dot_dimension_numbers<[1], [0], [0], [1], [0, 0, 1, 1], [], []>} : vector<8x32xf32>, vector<32x32xf32>, vector<8x32xf32> -> vector<8x32xf32>
    %331 = vector.extract_strided_slice %5 {offsets = [7, 0, 0], sizes = [1, 8, 32], strides = [1, 1, 1]} : vector<8x8x32xf32> to vector<1x8x32xf32>
    %332 = vector.shape_cast %331 : vector<1x8x32xf32> to vector<8x32xf32>
    %333 = arith.addf %330, %332 : vector<8x32xf32>
    %cst_180 = arith.constant 0.000000e+00 : f32
    %334 = vector.broadcast %cst_180 : f32 to vector<8x32xf32>
    %335 = arith.maximumf %333, %334 : vector<8x32xf32>
    %cst_181 = arith.constant dense<0.000000e+00> : vector<8x32xf32>
    %336 = tpu.matmul %317, %329, %cst_181 {dimension_numbers = #tpu.dot_dimension_numbers<[1], [0], [0], [1], [0, 0, 1, 1], [], []>} : vector<8x32xf32>, vector<32x32xf32>, vector<8x32xf32> -> vector<8x32xf32>
    %337 = vector.extract_strided_slice %11 {offsets = [7, 0, 0], sizes = [1, 8, 32], strides = [1, 1, 1]} : vector<8x8x32xf32> to vector<1x8x32xf32>
    %338 = vector.shape_cast %337 : vector<1x8x32xf32> to vector<8x32xf32>
    %339 = arith.addf %336, %338 : vector<8x32xf32>
    %cst_182 = arith.constant 0.000000e+00 : f32
    %340 = vector.broadcast %cst_182 : f32 to vector<8x32xf32>
    %341 = arith.maximumf %339, %340 : vector<8x32xf32>
    %342 = vector.extract_strided_slice %22 {offsets = [7, 0, 0], sizes = [1, 8, 128], strides = [1, 1, 1]} : vector<8x8x128xf32> to vector<1x8x128xf32>
    %343 = vector.shape_cast %342 : vector<1x8x128xf32> to vector<8x128xf32>
    %c7_183 = arith.constant 7 : index
    %c0_184 = arith.constant 0 : index
    %c0_185 = arith.constant 0 : index
    %344 = vector.load %arg11[%c7_183, %c0_184, %c0_185] : memref<8x32x128xf32, #tpu.memory_space<vmem>>, vector<1x32x128xf32>
    %345 = vector.shape_cast %344 : vector<1x32x128xf32> to vector<32x128xf32>
    %cst_186 = arith.constant dense<0.000000e+00> : vector<8x128xf32>
    %346 = tpu.matmul %335, %345, %cst_186 {dimension_numbers = #tpu.dot_dimension_numbers<[1], [0], [0], [1], [0, 0, 1, 1], [], []>} : vector<8x32xf32>, vector<32x128xf32>, vector<8x128xf32> -> vector<8x128xf32>
    %347 = arith.addf %343, %346 : vector<8x128xf32>
    %348 = arith.negf %347 : vector<8x128xf32>
    %349 = math.exp %348 : vector<8x128xf32>
    %cst_187 = arith.constant 1.000000e+00 : f32
    %350 = vector.broadcast %cst_187 : f32 to vector<8x128xf32>
    %351 = arith.addf %350, %349 : vector<8x128xf32>
    %352 = arith.divf %350, %351 : vector<8x128xf32>
    %353 = vector.extract_strided_slice %352 {offsets = [0, 0], sizes = [8, 32], strides = [1, 1]} : vector<8x128xf32> to vector<8x32xf32>
    %354 = vector.extract_strided_slice %352 {offsets = [0, 32], sizes = [8, 32], strides = [1, 1]} : vector<8x128xf32> to vector<8x32xf32>
    %355 = vector.extract_strided_slice %352 {offsets = [0, 96], sizes = [8, 32], strides = [1, 1]} : vector<8x128xf32> to vector<8x32xf32>
    %356 = vector.extract_strided_slice %347 {offsets = [0, 64], sizes = [8, 32], strides = [1, 1]} : vector<8x128xf32> to vector<8x32xf32>
    %357 = math.tanh %356 : vector<8x32xf32>
    %358 = arith.mulf %354, %341 : vector<8x32xf32>
    %359 = arith.mulf %353, %357 : vector<8x32xf32>
    %360 = arith.addf %358, %359 : vector<8x32xf32>
    %361 = math.tanh %360 : vector<8x32xf32>
    %362 = arith.mulf %355, %361 : vector<8x32xf32>
    %c7_188 = arith.constant 7 : index
    %c0_189 = arith.constant 0 : index
    %c0_190 = arith.constant 0 : index
    %363 = vector.load %arg20[%c7_188, %c0_189, %c0_190] : memref<8x8x32xf32, #tpu.memory_space<vmem>>, vector<1x8x32xf32>
    %364 = vector.shape_cast %363 : vector<1x8x32xf32> to vector<8x32xf32>
    %365 = vector.shape_cast %362 : vector<8x32xf32> to vector<1x8x32xf32>
    tpu.vector_store %arg20[%c7_188, %c0_189, %c0_190], %365 {strides = array<i32>} : memref<8x8x32xf32, #tpu.memory_space<vmem>>, vector<1x8x32xf32>,
    %c7_191 = arith.constant 7 : index
    %c0_192 = arith.constant 0 : index
    %c0_193 = arith.constant 0 : index
    %366 = vector.load %arg21[%c7_191, %c0_192, %c0_193] : memref<8x8x32xf32, #tpu.memory_space<vmem>>, vector<1x8x32xf32>
    %367 = vector.shape_cast %366 : vector<1x8x32xf32> to vector<8x32xf32>
    %368 = vector.shape_cast %360 : vector<8x32xf32> to vector<1x8x32xf32>
    tpu.vector_store %arg21[%c7_191, %c0_192, %c0_193], %368 {strides = array<i32>} : memref<8x8x32xf32, #tpu.memory_space<vmem>>, vector<1x8x32xf32>,
    %c0_194 = arith.constant 0 : index
    %c0_195 = arith.constant 0 : index
    %369 = vector.load %arg13[%c0_194, %c0_195] : memref<64x8xf32, #tpu.memory_space<vmem>>, vector<64x8xf32>
    %370 = vector.extract_strided_slice %369 {offsets = [0, 0], sizes = [32, 8], strides = [1, 1]} : vector<64x8xf32> to vector<32x8xf32>
    %cst_196 = arith.constant dense<0.000000e+00> : vector<8x8xf32>
    %371 = tpu.matmul %362, %370, %cst_196 {dimension_numbers = #tpu.dot_dimension_numbers<[1], [0], [0], [1], [0, 0, 1, 1], [], []>} : vector<8x32xf32>, vector<32x8xf32>, vector<8x8xf32> -> vector<8x8xf32>
    %372 = vector.extract_strided_slice %369 {offsets = [32, 0], sizes = [32, 8], strides = [1, 1]} : vector<64x8xf32> to vector<32x8xf32>
    %cst_197 = arith.constant dense<0.000000e+00> : vector<8x8xf32>
    %373 = tpu.matmul %360, %372, %cst_197 {dimension_numbers = #tpu.dot_dimension_numbers<[1], [0], [0], [1], [0, 0, 1, 1], [], []>} : vector<8x32xf32>, vector<32x8xf32>, vector<8x8xf32> -> vector<8x8xf32>
    %374 = arith.addf %371, %373 : vector<8x8xf32>
    %c0_198 = arith.constant 0 : index
    %c0_199 = arith.constant 0 : index
    %375 = vector.load %arg14[%c0_198, %c0_199] : memref<1x8xf32, #tpu.memory_space<vmem>>, vector<1x8xf32>
    %376 = vector.broadcast %375 : vector<1x8xf32> to vector<8x8xf32>
    %377 = arith.addf %374, %376 : vector<8x8xf32>
    %cst_200 = arith.constant 0.000000e+00 : f32
    %378 = vector.broadcast %cst_200 : f32 to vector<8x8xf32>
    %379 = arith.maximumf %377, %378 : vector<8x8xf32>
    %cst_201 = arith.constant dense<0.000000e+00> : vector<8xf32>
    %380 = vector.multi_reduction <add>, %379, %cst_201 [0] : vector<8x8xf32> to vector<8xf32>
    %381 = vector.shape_cast %380 : vector<8xf32> to vector<1x8xf32>
    %cst_202 = arith.constant 8.000000e+00 : f32
    %382 = vector.broadcast %cst_202 : f32 to vector<1x8xf32>
    %383 = arith.divf %381, %382 : vector<1x8xf32>
    %384 = vector.broadcast %383 : vector<1x8xf32> to vector<8x8xf32>
    %385 = arith.subf %379, %384 : vector<8x8xf32>
    %386 = arith.mulf %385, %385 : vector<8x8xf32>
    %cst_203 = arith.constant dense<0.000000e+00> : vector<8xf32>
    %387 = vector.multi_reduction <add>, %386, %cst_203 [0] : vector<8x8xf32> to vector<8xf32>
    %388 = vector.shape_cast %387 : vector<8xf32> to vector<1x8xf32>
    %cst_204 = arith.constant 8.000000e+00 : f32
    %389 = vector.broadcast %cst_204 : f32 to vector<1x8xf32>
    %390 = arith.divf %388, %389 : vector<1x8xf32>
    %391 = vector.broadcast %383 : vector<1x8xf32> to vector<8x8xf32>
    %392 = arith.subf %379, %391 : vector<8x8xf32>
    %cst_205 = arith.constant 9.99999974E-6 : f32
    %393 = vector.broadcast %cst_205 : f32 to vector<1x8xf32>
    %394 = arith.addf %390, %393 : vector<1x8xf32>
    %395 = math.rsqrt %394 : vector<1x8xf32>
    %396 = vector.broadcast %395 : vector<1x8xf32> to vector<8x8xf32>
    %397 = arith.mulf %392, %396 : vector<8x8xf32>
    %c0_206 = arith.constant 0 : index
    %c0_207 = arith.constant 0 : index
    %398 = vector.load %arg15[%c0_206, %c0_207] : memref<1x8xf32, #tpu.memory_space<vmem>>, vector<1x8xf32>
    %399 = vector.broadcast %398 : vector<1x8xf32> to vector<8x8xf32>
    %400 = arith.mulf %397, %399 : vector<8x8xf32>
    %c0_208 = arith.constant 0 : index
    %c0_209 = arith.constant 0 : index
    %401 = vector.load %arg16[%c0_208, %c0_209] : memref<1x8xf32, #tpu.memory_space<vmem>>, vector<1x8xf32>
    %402 = vector.broadcast %401 : vector<1x8xf32> to vector<8x8xf32>
    %403 = arith.addf %400, %402 : vector<8x8xf32>
    %404 = arith.negf %403 : vector<8x8xf32>
    %405 = math.exp %404 : vector<8x8xf32>
    %cst_210 = arith.constant 1.000000e+00 : f32
    %406 = vector.broadcast %cst_210 : f32 to vector<8x8xf32>
    %407 = arith.addf %406, %405 : vector<8x8xf32>
    %408 = arith.divf %406, %407 : vector<8x8xf32>
    %c0_211 = arith.constant 0 : index
    %c0_212 = arith.constant 0 : index
    %409 = vector.load %arg17[%c0_211, %c0_212] : memref<8x8xf32, #tpu.memory_space<vmem>>, vector<8x8xf32>
    tpu.vector_store %arg17[%c0_211, %c0_212], %408 {strides = array<i32>} : memref<8x8xf32, #tpu.memory_space<vmem>>, vector<8x8xf32>,
    %c0_213 = arith.constant 0 : index
    %c0_214 = arith.constant 0 : index
    %410 = vector.load %arg18[%c0_213, %c0_214] : memref<8x32xf32, #tpu.memory_space<vmem>>, vector<8x32xf32>
    tpu.vector_store %arg18[%c0_213, %c0_214], %362 {strides = array<i32>} : memref<8x32xf32, #tpu.memory_space<vmem>>, vector<8x32xf32>,
    %c0_215 = arith.constant 0 : index
    %c0_216 = arith.constant 0 : index
    %411 = vector.load %arg19[%c0_215, %c0_216] : memref<8x32xf32, #tpu.memory_space<vmem>>, vector<8x32xf32>
    tpu.vector_store %arg19[%c0_215, %c0_216], %360 {strides = array<i32>} : memref<8x32xf32, #tpu.memory_space<vmem>>, vector<8x32xf32>,
    return
  }
}

</mosaic_0001>

<bundles_post_ra>
// kernel: tpu_custom_call.1
= control target key start
LH: loop header
LB: loop body
LE: loop exit
PB: predicated region body
PF: predicated region fallthrough
CT: control target
= control target key end

     0   :  { %s6440_s0 = inlined_call_operand.vmem [shape: f32[8,8,1], index: 0, kind: input, shape index: {}]   ;;  %s6441_s1 = inlined_call_operand.vmem [shape: f32[8,32], index: 1, kind: input, shape index: {}]   ;;  %s6442_s2 = inlined_call_operand.vmem [shape: f32[8,32], index: 2, kind: input, shape index: {}]   ;;  %s6443_s3 = inlined_call_operand.vmem [shape: f32[8,8,32], index: 3, kind: input, shape index: {}]   ;;  %s6444_s4 = inlined_call_operand.vmem [shape: f32[8,8,32], index: 4, kind: input, shape index: {}]   ;;  %s6445_s5 = inlined_call_operand.vmem [shape: f32[8,64,32], index: 5, kind: input, shape index: {}]   ;;  %s6446_s6 = inlined_call_operand.vmem [shape: f32[8,1,32], index: 6, kind: input, shape index: {}]   ;;  %s6447_s7 = inlined_call_operand.vmem [shape: f32[8,64,32], index: 7, kind: input, shape index: {}]   ;;  %s6448_s8 = inlined_call_operand.vmem [shape: f32[8,1,32], index: 8, kind: input, shape index: {}]   ;;  %s6449_s9 = inlined_call_operand.vmem [shape: f32[8,1,128], index: 9, kind: input, shape index: {}]   ;;  %s6450_s10 = inlined_call_operand.vmem [shape: f32[8,1,128], index: 10, kind: input, shape index: {}]   ;;  %s6451_s11 = inlined_call_operand.vmem [shape: f32[8,32,128], index: 11, kind: input, shape index: {}]   ;;  %s6452_s12 = inlined_call_operand.vmem [shape: f32[8,1,128], index: 12, kind: input, shape index: {}]   ;;  %s6453_s13 = inlined_call_operand.vmem [shape: f32[64,8], index: 13, kind: input, shape index: {}]   ;;  %s6454_s14 = inlined_call_operand.vmem [shape: f32[1,8], index: 14, kind: input, shape index: {}]   ;;  %s6455_s15 = inlined_call_operand.vmem [shape: f32[1,8], index: 15, kind: input, shape index: {}]   ;;  %s6456_s16 = inlined_call_operand.vmem [shape: f32[1,8], index: 16, kind: input, shape index: {}]   ;;  %s6457_s17 = inlined_call_operand.hbm [shape: f32[8,8], index: 17, kind: output, shape index: {0}]   ;;  %s6458_s18 = inlined_call_operand.hbm [shape: f32[8,32], index: 18, kind: output, shape index: {1}]   ;;  %s6459_s19 = inlined_call_operand.hbm [shape: f32[8,32], index: 19, kind: output, shape index: {2}]   ;;  %s6460_s20 = inlined_call_operand.hbm [shape: f32[8,8,32], index: 20, kind: output, shape index: {3}]   ;;  %s6461_s21 = inlined_call_operand.hbm [shape: f32[8,8,32], index: 21, kind: output, shape index: {4}]  }
   0x1   :  { %6466 = sst [smem:[#allocation13_spill]] %s6440_s0 }
   0x2   :  { %6467 = sst [smem:[#allocation14_spill]] %s6441_s1 }
   0x3   :  { %6468 = sst [smem:[#allocation15_spill]] %s6442_s2 }
   0x4   :  { %6469 = sst [smem:[#allocation16_spill]] %s6443_s3 }
   0x5   :  { %6470 = sst [smem:[#allocation17_spill]] %s6444_s4 }
   0x6   :  { %6471 = sst [smem:[#allocation18_spill]] %s6445_s5 }
   0x7   :  { %27 = vsyncpa [#allocation3], 0 }
   0x8   :  { %28 = vsyncpa [#allocation5], 0  ;;  %s6472_s26 = sld [smem:[#allocation18_spill]]  ;;  %v5186_v2 = vmov 0.0   ;;  %vm160_vm0 = vcmask 261120   ;;  %vm5187_vm1 = vmmov 0  }
   0x9   :  { %4533 = vmatprep.subr.mxu0 %v5186_v2  ;;  %4544 = vmatprep.subr.mxu1 %v5186_v2  ;;  %s6473_s28 = sld [smem:[#allocation16_spill]] }
   0xa   :  { %4541 = vmatprep.mubr.msk.f32.mxu0 %vm5187_vm1, %v5186_v2  ;;  %4552 = vmatprep.mubr.msk.f32.mxu1 %vm5187_vm1, %v5186_v2 }
   0xe   :  { %v75_v0 = vld [vmem:[%s6472_s26 + $0x38] sm:$0xff]  ;;  %v74_v3 = vld [vmem:[%s6472_s26 + $0x30] sm:$0xff]  ;;  %v73_v5 = vld [vmem:[%s6472_s26 + $0x28] sm:$0xff] }
   0xf   :  { %v79_v1 = vld [vmem:[%s6472_s26 + $0x78] sm:$0xff]  ;;  %v78_v4 = vld [vmem:[%s6472_s26 + $0x70] sm:$0xff]  ;;  %4534 = vmatpush3.msra.mxu0 %v75_v0  ;;  %v77_v6 = vld [vmem:[%s6472_s26 + $0x68] sm:$0xff] }
  0x10   :  { %4545 = vmatpush3.msra.mxu1 %v79_v1  ;;  %4535 = vmatprep.subr.mxu0 %v5186_v2  ;;  %v72_v7 = vld [vmem:[%s6472_s26 + $0x20] sm:$0xff]  ;;  %v65_v10 = vld [vmem:[%s6473_s28 + $0x8] sm:$0xff]  ;;  %v83_v11 = vld [vmem:[%s6472_s26 + $0xb8] sm:$0xff] }
  0x11   :  { %4546 = vmatprep.subr.mxu1 %v5186_v2  ;;  %4536 = vmatpush3.msra.mxu0 %v74_v3  ;;  %v76_v8 = vld [vmem:[%s6472_s26 + $0x60] sm:$0xff]  ;;  %v87_v12 = vld [vmem:[%s6472_s26 + $0xf8] sm:$0xff]  ;;  %v82_v13 = vld [vmem:[%s6472_s26 + $0xb0] sm:$0xff] }
  0x12   :  { %4547 = vmatpush3.msra.mxu1 %v78_v4  ;;  %4537 = vmatprep.subr.mxu0 %v5186_v2  ;;  %v64_v9 = vld [vmem:[%s6473_s28] sm:$0xff]  ;;  %v86_v14 = vld [vmem:[%s6472_s26 + $0xf0] sm:$0xff]  ;;  %v81_v15 = vld [vmem:[%s6472_s26 + $0xa8] sm:$0xff] }
  0x13   :  { %4548 = vmatprep.subr.mxu1 %v5186_v2  ;;  %4538 = vmatpush3.msra.mxu0 %v73_v5  ;;  %v85_v16 = vld [vmem:[%s6472_s26 + $0xe8] sm:$0xff]  ;;  %v80_v17 = vld [vmem:[%s6472_s26 + $0xa0] sm:$0xff]  ;;  %v66_v19 = vld [vmem:[%s6473_s28 + $0x10] sm:$0xff] }
  0x14   :  { %4549 = vmatpush3.msra.mxu1 %v77_v6  ;;  %4539 = vmatprep.subr.mxu0 %v5186_v2  ;;  %v84_v18 = vld [vmem:[%s6472_s26 + $0xe0] sm:$0xff]  ;;  %v67_v20 = vld [vmem:[%s6473_s28 + $0x18] sm:$0xff]  ;;  %v90_v23 = vld [vmem:[%s6472_s26 + $0x130] sm:$0xff] }
  0x15   :  { %4550 = vmatprep.subr.mxu1 %v5186_v2  ;;  %4540 = vmatpush3.msra.mxu0 %v72_v7  ;;  %v91_v21 = vld [vmem:[%s6472_s26 + $0x138] sm:$0xff]  ;;  %v94_v24 = vld [vmem:[%s6472_s26 + $0x170] sm:$0xff]  ;;  %v89_v25 = vld [vmem:[%s6472_s26 + $0x128] sm:$0xff] }
  0x16   :  { %4551 = vmatpush3.msra.mxu1 %v76_v8  ;;  %4542 = vmatmul.mubr.msk.f32.vlgmr.msra.gmra.mxu0 %vm160_vm0, %v64_v9  ;;  %v95_v22 = vld [vmem:[%s6472_s26 + $0x178] sm:$0xff]  ;;  %v93_v26 = vld [vmem:[%s6472_s26 + $0x168] sm:$0xff]  ;;  %v88_v27 = vld [vmem:[%s6472_s26 + $0x120] sm:$0xff] }
  0x17   :  { %4555 = vmatprep.subr.mxu0 %v5186_v2  ;;  %4566 = vmatprep.subr.mxu1 %v5186_v2  ;;  %v92_v28 = vld [vmem:[%s6472_s26 + $0x160] sm:$0xff]  ;;  %v69_v30 = vld [vmem:[%s6473_s28 + $0x28] sm:$0xff]  ;;  %v99_v31 = vld [vmem:[%s6472_s26 + $0x1b8] sm:$0xff] }
  0x18   :  { %4553 = vmatmul.mubr.msk.f32.vlgmr.msra.gmra.mxu1 %vm160_vm0, %v65_v10  ;;  %4556 = vmatpush3.msra.mxu0 %v83_v11  ;;  %v68_v29 = vld [vmem:[%s6473_s28 + $0x20] sm:$0xff]  ;;  %v103_v32 = vld [vmem:[%s6472_s26 + $0x1f8] sm:$0xff] }
  0x19   :  { %4567 = vmatpush3.msra.mxu1 %v87_v12  ;;  %4557 = vmatprep.subr.mxu0 %v5186_v2 }
  0x1a   :  { %4568 = vmatprep.subr.mxu1 %v5186_v2  ;;  %4558 = vmatpush3.msra.mxu0 %v82_v13 }
  0x1b   :  { %4569 = vmatpush3.msra.mxu1 %v86_v14  ;;  %4559 = vmatprep.subr.mxu0 %v5186_v2 }
  0x1c   :  { %4570 = vmatprep.subr.mxu1 %v5186_v2  ;;  %4560 = vmatpush3.msra.mxu0 %v81_v15 }
  0x1d   :  { %4571 = vmatpush3.msra.mxu1 %v85_v16  ;;  %4561 = vmatprep.subr.mxu0 %v5186_v2 }
  0x1e   :  { %4572 = vmatprep.subr.mxu1 %v5186_v2  ;;  %4562 = vmatpush3.msra.mxu0 %v80_v17 }
  0x1f   :  { %4563 = vmatprep.mubr.msk.f32.mxu0 %vm5187_vm1, %v5186_v2  ;;  %4573 = vmatpush3.msra.mxu1 %v84_v18 }
  0x20   :  { %4564 = vmatmul.mubr.msk.f32.vlgmr.msra.gmra.mxu0 %vm160_vm0, %v66_v19  ;;  %4574 = vmatprep.mubr.msk.f32.mxu1 %vm5187_vm1, %v5186_v2 }
  0x21   :  { %4577 = vmatprep.subr.mxu0 %v5186_v2  ;;  %4588 = vmatprep.subr.mxu1 %v5186_v2 }
  0x22   :  { %4575 = vmatmul.mubr.msk.f32.vlgmr.msra.gmra.mxu1 %vm160_vm0, %v67_v20  ;;  %4578 = vmatpush3.msra.mxu0 %v91_v21 }
  0x23   :  { %4589 = vmatpush3.msra.mxu1 %v95_v22  ;;  %4579 = vmatprep.subr.mxu0 %v5186_v2 }
  0x24   :  { %4590 = vmatprep.subr.mxu1 %v5186_v2  ;;  %4580 = vmatpush3.msra.mxu0 %v90_v23 }
  0x25   :  { %4591 = vmatpush3.msra.mxu1 %v94_v24  ;;  %4581 = vmatprep.subr.mxu0 %v5186_v2 }
  0x26   :  { %4592 = vmatprep.subr.mxu1 %v5186_v2  ;;  %4582 = vmatpush3.msra.mxu0 %v89_v25 }
  0x27   :  { %4593 = vmatpush3.msra.mxu1 %v93_v26  ;;  %4583 = vmatprep.subr.mxu0 %v5186_v2 }
  0x28   :  { %4594 = vmatprep.subr.mxu1 %v5186_v2  ;;  %4584 = vmatpush3.msra.mxu0 %v88_v27 }
  0x29   :  { %4585 = vmatprep.mubr.msk.f32.mxu0 %vm5187_vm1, %v5186_v2  ;;  %4595 = vmatpush3.msra.mxu1 %v92_v28 }
  0x2a   :  { %4586 = vmatmul.mubr.msk.f32.vlgmr.msra.gmra.mxu0 %vm160_vm0, %v68_v29  ;;  %4596 = vmatprep.mubr.msk.f32.mxu1 %vm5187_vm1, %v5186_v2 }
  0x2b   :  { %4599 = vmatprep.subr.mxu0 %v5186_v2 }
  0x2c   :  { %29 = vsyncpa [#allocation8], 0  ;;  %4610 = vmatprep.subr.mxu1 %v5186_v2  ;;  %4597 = vmatmul.mubr.msk.f32.vlgmr.msra.gmra.mxu1 %vm160_vm0, %v69_v30  ;;  %v98_v33 = vld [vmem:[%s6472_s26 + $0x1b0] sm:$0xff]  ;;  %v97_v35 = vld [vmem:[%s6472_s26 + $0x1a8] sm:$0xff]  ;;  %s6476_s5 = sld [smem:[#allocation15_spill]]  ;;  %s5189_s23 = smov 32  }
  0x2d   :  { %v102_v34 = vld [vmem:[%s6472_s26 + $0x1f0] sm:$0xff]  ;;  %4600 = vmatpush3.msra.mxu0 %v99_v31  ;;  %4611 = vmatpush3.msra.mxu1 %v103_v32  ;;  %v101_v36 = vld [vmem:[%s6472_s26 + $0x1e8] sm:$0xff]  ;;  %v96_v37 = vld [vmem:[%s6472_s26 + $0x1a0] sm:$0xff]  ;;  %s5190_s29 = smov 64   ;;  %s5191_s1 = smov 96  }
  0x2e   :  { %4601 = vmatprep.subr.mxu0 %v5186_v2  ;;  %4612 = vmatprep.subr.mxu1 %v5186_v2  ;;  %v100_v38 = vld [vmem:[%s6472_s26 + $0x1e0] sm:$0xff]  ;;  %v70_v39 = vld [vmem:[%s6473_s28 + $0x30] sm:$0xff]  ;;  %v71_v40 = vld [vmem:[%s6473_s28 + $0x38] sm:$0xff]  ;;  %s6474_s28 = sld [smem:[#allocation17_spill]] }
  0x2f   :  { %4602 = vmatpush3.msra.mxu0 %v98_v33  ;;  %4613 = vmatpush3.msra.mxu1 %v102_v34  ;;  %v756_v41 = vld [vmem:[%s6447_s7 + $0x38] sm:$0xff]  ;;  %v755_v43 = vld [vmem:[%s6447_s7 + $0x30] sm:$0xff]  ;;  %v754_v45 = vld [vmem:[%s6447_s7 + $0x28] sm:$0xff]  ;;  %v5188_v33 = vmov 0  }
  0x30   :  { %4603 = vmatprep.subr.mxu0 %v5186_v2  ;;  %4614 = vmatprep.subr.mxu1 %v5186_v2  ;;  %v760_v42 = vld [vmem:[%s6447_s7 + $0x78] sm:$0xff]  ;;  %v759_v44 = vld [vmem:[%s6447_s7 + $0x70] sm:$0xff]  ;;  %v758_v46 = vld [vmem:[%s6447_s7 + $0x68] sm:$0xff] }
  0x31   :  { %4604 = vmatpush3.msra.mxu0 %v97_v35  ;;  %4615 = vmatpush3.msra.mxu1 %v101_v36  ;;  %v753_v47 = vld [vmem:[%s6447_s7 + $0x20] sm:$0xff]  ;;  %v764_v51 = vld [vmem:[%s6447_s7 + $0xb8] sm:$0xff]  ;;  %v763_v53 = vld [vmem:[%s6447_s7 + $0xb0] sm:$0xff] }
  0x32   :  { %4605 = vmatprep.subr.mxu0 %v5186_v2  ;;  %4616 = vmatprep.subr.mxu1 %v5186_v2  ;;  %v757_v48 = vld [vmem:[%s6447_s7 + $0x60] sm:$0xff]  ;;  %v768_v52 = vld [vmem:[%s6447_s7 + $0xf8] sm:$0xff]  ;;  %v767_v54 = vld [vmem:[%s6447_s7 + $0xf0] sm:$0xff] }
  0x33   :  { %4606 = vmatpush3.msra.mxu0 %v96_v37  ;;  %4607 = vmatprep.mubr.msk.f32.mxu0 %vm5187_vm1, %v5186_v2  ;;  %v762_v55 = vld [vmem:[%s6447_s7 + $0xa8] sm:$0xff]  ;;  %v761_v57 = vld [vmem:[%s6447_s7 + $0xa0] sm:$0xff]  ;;  %v772_v61 = vld [vmem:[%s6447_s7 + $0x138] sm:$0xff] }
  0x34   :  { %4617 = vmatpush3.msra.mxu1 %v100_v38  ;;  %4608 = vmatmul.mubr.msk.f32.vlgmr.msra.gmra.mxu0 %vm160_vm0, %v70_v39  ;;  %v745_v49 = vld [vmem:[%s6474_s28] sm:$0xff]  ;;  %v746_v50 = vld [vmem:[%s6474_s28 + $0x8] sm:$0xff]  ;;  %v747_v59 = vld [vmem:[%s6474_s28 + $0x10] sm:$0xff] }
  0x35   :  { %4618 = vmatprep.mubr.msk.f32.mxu1 %vm5187_vm1, %v5186_v2  ;;  %4621 = vmatprep.subr.mxu0 %v5186_v2  ;;  %v766_v56 = vld [vmem:[%s6447_s7 + $0xe8] sm:$0xff]  ;;  %v765_v58 = vld [vmem:[%s6447_s7 + $0xe0] sm:$0xff]  ;;  %v748_v60 = vld [vmem:[%s6474_s28 + $0x18] sm:$0xff] }
  0x36   :  { %4632 = vmatprep.subr.mxu1 %v5186_v2  ;;  %4619 = vmatmul.mubr.msk.f32.vlgmr.msra.gmra.mxu1 %vm160_vm0, %v71_v40  ;;  %v776_v62 = vld [vmem:[%s6447_s7 + $0x178] sm:$0xff]  ;;  %v771_v63 = vld [vmem:[%s6447_s7 + $0x130] sm:$0xff]  ;;  %v770_v1 = vld [vmem:[%s6447_s7 + $0x128] sm:$0xff] }
  0x37   :  { %4622 = vmatpush3.msra.mxu0 %v756_v41  ;;  %4633 = vmatpush3.msra.mxu1 %v760_v42  ;;  %v775_v0 = vld [vmem:[%s6447_s7 + $0x170] sm:$0xff]  ;;  %v774_v3 = vld [vmem:[%s6447_s7 + $0x168] sm:$0xff]  ;;  %v769_v4 = vld [vmem:[%s6447_s7 + $0x120] sm:$0xff] }
  0x38   :  { %4623 = vmatprep.subr.mxu0 %v5186_v2  ;;  %4634 = vmatprep.subr.mxu1 %v5186_v2  ;;  %v773_v5 = vld [vmem:[%s6447_s7 + $0x160] sm:$0xff]  ;;  %v750_v7 = vld [vmem:[%s6474_s28 + $0x28] sm:$0xff]  ;;  %v780_v8 = vld [vmem:[%s6447_s7 + $0x1b8] sm:$0xff] }
  0x39   :  { %4624 = vmatpush3.msra.mxu0 %v755_v43  ;;  %4635 = vmatpush3.msra.mxu1 %v759_v44  ;;  %v749_v6 = vld [vmem:[%s6474_s28 + $0x20] sm:$0xff]  ;;  %v784_v9 = vld [vmem:[%s6447_s7 + $0x1f8] sm:$0xff]  ;;  %v779_v10 = vld [vmem:[%s6447_s7 + $0x1b0] sm:$0xff] }
  0x3a   :  { %4625 = vmatprep.subr.mxu0 %v5186_v2  ;;  %4636 = vmatprep.subr.mxu1 %v5186_v2  ;;  %v783_v11 = vld [vmem:[%s6447_s7 + $0x1f0] sm:$0xff]  ;;  %v778_v12 = vld [vmem:[%s6447_s7 + $0x1a8] sm:$0xff]  ;;  %v777_v14 = vld [vmem:[%s6447_s7 + $0x1a0] sm:$0xff] }
  0x3b   :  { %4626 = vmatpush3.msra.mxu0 %v754_v45  ;;  %4637 = vmatpush3.msra.mxu1 %v758_v46  ;;  %v782_v13 = vld [vmem:[%s6447_s7 + $0x1e8] sm:$0xff]  ;;  %v781_v15 = vld [vmem:[%s6447_s7 + $0x1e0] sm:$0xff]  ;;  %v751_v16 = vld [vmem:[%s6474_s28 + $0x30] sm:$0xff] }
  0x3c   :  { %4627 = vmatprep.subr.mxu0 %v5186_v2  ;;  %4638 = vmatprep.subr.mxu1 %v5186_v2  ;;  %v752_v17 = vld [vmem:[%s6474_s28 + $0x38] sm:$0xff]  ;;  %v1669_v20 = vld [vmem:[%s6472_s26 + $0x10] sm:$0xff]  ;;  %v1668_v22 = vld [vmem:[%s6472_s26 + $0x8] sm:$0xff]  ;;  %s6475_s28 = sld [smem:[#allocation14_spill]] }
  0x3d   :  { %4628 = vmatpush3.msra.mxu0 %v753_v47  ;;  %4629 = vmatprep.mubr.msk.f32.mxu0 %vm5187_vm1, %v5186_v2  ;;  %v1670_v18 = vld [vmem:[%s6472_s26 + $0x18] sm:$0xff]  ;;  %v1673_v21 = vld [vmem:[%s6447_s7 + $0x10] sm:$0xff]  ;;  %v1672_v23 = vld [vmem:[%s6447_s7 + $0x8] sm:$0xff] }
  0x3e   :  { %4639 = vmatpush3.msra.mxu1 %v757_v48  ;;  %4630 = vmatmul.mubr.msk.f32.vlgmr.msra.gmra.mxu0 %vm160_vm0, %v745_v49  ;;  %v1674_v19 = vld [vmem:[%s6447_s7 + $0x18] sm:$0xff]  ;;  %v1667_v24 = vld [vmem:[%s6472_s26] sm:$0xff]  ;;  %v1825_v29 = vld [vmem:[%s6451_s11 + $0x10] sm:$0xff] }
  0x3f   :  { %4640 = vmatprep.mubr.msk.f32.mxu1 %vm5187_vm1, %v5186_v2  ;;  %4643 = vmatprep.subr.mxu0 %v5186_v2  ;;  %v1671_v25 = vld [vmem:[%s6447_s7] sm:$0xff]  ;;  %v1826_v28 = vld [vmem:[%s6451_s11 + $0x18] sm:$0xff]  ;;  %v1824_v30 = vld [vmem:[%s6451_s11 + $0x8] sm:$0xff] }
  0x40   :  { %4654 = vmatprep.subr.mxu1 %v5186_v2  ;;  %4641 = vmatmul.mubr.msk.f32.vlgmr.msra.gmra.mxu1 %vm160_vm0, %v746_v50  ;;  %v1666_v27 = vld [vmem:[%s6476_s5] sm:$0xff] }
  0x41   :  { %4644 = vmatpush3.msra.mxu0 %v764_v51  ;;  %4655 = vmatpush3.msra.mxu1 %v768_v52  ;;  %v1823_v31 = vld [vmem:[%s6451_s11] sm:$0xff] }
  0x42   :  { %4645 = vmatprep.subr.mxu0 %v5186_v2  ;;  %4656 = vmatprep.subr.mxu1 %v5186_v2  ;;  %v1665_v26 = vld [vmem:[%s6475_s28] sm:$0xff]  ;;  %s6477_s28 = sld [smem:[#allocation13_spill]] }
  0x43   :  { %4646 = vmatpush3.msra.mxu0 %v763_v53  ;;  %4657 = vmatpush3.msra.mxu1 %v767_v54 }
  0x44   :  { %4647 = vmatprep.subr.mxu0 %v5186_v2  ;;  %4658 = vmatprep.subr.mxu1 %v5186_v2 }
  0x45   :  { %4648 = vmatpush3.msra.mxu0 %v762_v55  ;;  %4659 = vmatpush3.msra.mxu1 %v766_v56 }
  0x46   :  { %4649 = vmatprep.subr.mxu0 %v5186_v2  ;;  %4660 = vmatprep.subr.mxu1 %v5186_v2 }
  0x47   :  { %4650 = vmatpush3.msra.mxu0 %v761_v57  ;;  %4651 = vmatprep.mubr.msk.f32.mxu0 %vm5187_vm1, %v5186_v2 }
  0x48   :  { %4661 = vmatpush3.msra.mxu1 %v765_v58  ;;  %4652 = vmatmul.mubr.msk.f32.vlgmr.msra.gmra.mxu0 %vm160_vm0, %v747_v59  ;;  %v1425_v32 = vld [vmem:[%s6477_s28] sm:$0xff] }
  0x49   :  { %4662 = vmatprep.mubr.msk.f32.mxu1 %vm5187_vm1, %v5186_v2  ;;  %4665 = vmatprep.subr.mxu0 %v5186_v2 }
  0x4a   :  { %4676 = vmatprep.subr.mxu1 %v5186_v2  ;;  %4663 = vmatmul.mubr.msk.f32.vlgmr.msra.gmra.mxu1 %vm160_vm0, %v748_v60 }
  0x4b   :  { %4666 = vmatpush3.msra.mxu0 %v772_v61  ;;  %4677 = vmatpush3.msra.mxu1 %v776_v62 }
  0x4c   :  { %4667 = vmatprep.subr.mxu0 %v5186_v2  ;;  %4678 = vmatprep.subr.mxu1 %v5186_v2 }
  0x4d   :  { %4668 = vmatpush3.msra.mxu0 %v771_v63  ;;  %4679 = vmatpush3.msra.mxu1 %v775_v0 }
  0x4e   :  { %4669 = vmatprep.subr.mxu0 %v5186_v2  ;;  %4680 = vmatprep.subr.mxu1 %v5186_v2 }
  0x4f   :  { %4670 = vmatpush3.msra.mxu0 %v770_v1  ;;  %4681 = vmatpush3.msra.mxu1 %v774_v3  ;;  %v4145_v3 = vld [vmem:[%s6446_s6] ss:$0 sm:$0xff] }
  0x50   :  { %4671 = vmatprep.subr.mxu0 %v5186_v2  ;;  %4682 = vmatprep.subr.mxu1 %v5186_v2 }
  0x51   :  { %4672 = vmatpush3.msra.mxu0 %v769_v4  ;;  %4673 = vmatprep.mubr.msk.f32.mxu0 %vm5187_vm1, %v5186_v2  ;;  %v4161_v4 = vld [vmem:[%s6448_s8] ss:$0 sm:$0xff] }
  0x52   :  { %4683 = vmatpush3.msra.mxu1 %v773_v5  ;;  %4674 = vmatmul.mubr.msk.f32.vlgmr.msra.gmra.mxu0 %vm160_vm0, %v749_v6 }
  0x53   :  { %4684 = vmatprep.mubr.msk.f32.mxu1 %vm5187_vm1, %v5186_v2  ;;  %4687 = vmatprep.subr.mxu0 %v5186_v2 }
  0x54   :  { %4698 = vmatprep.subr.mxu1 %v5186_v2  ;;  %4685 = vmatmul.mubr.msk.f32.vlgmr.msra.gmra.mxu1 %vm160_vm0, %v750_v7 }
  0x55   :  { %4688 = vmatpush3.msra.mxu0 %v780_v8  ;;  %4699 = vmatpush3.msra.mxu1 %v784_v9 }
  0x56   :  { %4689 = vmatprep.subr.mxu0 %v5186_v2  ;;  %4700 = vmatprep.subr.mxu1 %v5186_v2 }
  0x57   :  { %4690 = vmatpush3.msra.mxu0 %v779_v10  ;;  %4701 = vmatpush3.msra.mxu1 %v783_v11 }
  0x58   :  { %4691 = vmatprep.subr.mxu0 %v5186_v2  ;;  %4702 = vmatprep.subr.mxu1 %v5186_v2 }
  0x59   :  { %4692 = vmatpush3.msra.mxu0 %v778_v12  ;;  %4703 = vmatpush3.msra.mxu1 %v782_v13 }
  0x5a   :  { %4693 = vmatprep.subr.mxu0 %v5186_v2  ;;  %4704 = vmatprep.subr.mxu1 %v5186_v2 }
  0x5b   :  { %4694 = vmatpush3.msra.mxu0 %v777_v14  ;;  %4695 = vmatprep.mubr.msk.f32.mxu0 %vm5187_vm1, %v5186_v2 }
  0x5c   :  { %4705 = vmatpush3.msra.mxu1 %v781_v15  ;;  %4696 = vmatmul.mubr.msk.f32.vlgmr.msra.gmra.mxu0 %vm160_vm0, %v751_v16  ;;  %v4177_v15 = vld [vmem:[%s6449_s9] ss:$0 sm:$0xff] }
  0x5d   :  { %4706 = vmatprep.mubr.msk.f32.mxu1 %vm5187_vm1, %v5186_v2  ;;  %4709 = vmatprep.subr.mxu0 %v5186_v2 }
  0x5e   :  { %4720 = vmatprep.subr.mxu1 %v5186_v2  ;;  %4707 = vmatmul.mubr.msk.f32.vlgmr.msra.gmra.mxu1 %vm160_vm0, %v752_v17 }
  0x5f   :  { %4710 = vmatpush3.msra.mxu0 %v1670_v18  ;;  %4721 = vmatpush3.msra.mxu1 %v1674_v19  ;;  %v4185_v18 = vld [vmem:[%s6450_s10] ss:$0 sm:$0xff] }
  0x60   :  { %4711 = vmatprep.subr.mxu0 %v5186_v2  ;;  %4722 = vmatprep.subr.mxu1 %v5186_v2 }
  0x61   :  { %4712 = vmatpush3.msra.mxu0 %v1669_v20  ;;  %4723 = vmatpush3.msra.mxu1 %v1673_v21  ;;  %v4193_v20 = vld [vmem:[%s6452_s12] ss:$0 sm:$0xff] }
  0x62   :  { %4713 = vmatprep.subr.mxu0 %v5186_v2  ;;  %4724 = vmatprep.subr.mxu1 %v5186_v2 }
  0x63   :  { %4714 = vmatpush3.msra.mxu0 %v1668_v22  ;;  %4725 = vmatpush3.msra.mxu1 %v1672_v23 }
  0x64   :  { %4715 = vmatprep.subr.mxu0 %v5186_v2  ;;  %4726 = vmatprep.subr.mxu1 %v5186_v2 }
  0x65   :  { %4716 = vmatpush3.msra.mxu0 %v1667_v24  ;;  %4717 = vmatprep.mubr.msk.f32.mxu0 %vm5187_vm1, %v5186_v2 }
  0x66   :  { %4727 = vmatpush3.msra.mxu1 %v1671_v25  ;;  %4728 = vmatprep.mubr.msk.f32.mxu1 %vm5187_vm1, %v5186_v2 }
  0x67   :  { %4718 = vmatmul.mubr.msk.f32.vlgmr.msra.gmra.mxu0 %vm160_vm0, %v1665_v26  ;;  %4729 = vmatmul.mubr.msk.f32.vlgmr.msra.gmra.mxu1 %vm160_vm0, %v1666_v27 }
  0x68   :  { %4731 = vmatprep.subr.mxu0 %v5186_v2  ;;  %4739 = vmatprep.mubr.msk.f32.mxu0 %vm5187_vm1, %v5186_v2 }
  0x69   :  { %4742 = vmatprep.subr.mxu1 %v5186_v2  ;;  %4750 = vmatprep.mubr.msk.f32.mxu1 %vm5187_vm1, %v5186_v2 }
  0x6a   :  { %4732 = vmatpush3.msra.mxu0 %v1826_v28  ;;  %5008 = vset.pattern.permute.xlu0 %v5188_v33 }
  0x6b   :  { %4733 = vmatprep.subr.mxu0 %v5186_v2  ;;  %5009 = vset.pattern.permute.xlu1 %v5188_v33  ;;  %v4211_v33 = vld [vmem:[%s6447_s7 + $0x50] sm:$0xff] }
  0x6c   :  { %4734 = vmatpush3.msra.mxu0 %v1825_v29  ;;  %1443 = vperm.xlu0 %5008, %v1425_v32   ;;  %v4212_v32 = vld [vmem:[%s6447_s7 + $0x58] sm:$0xff] }
  0x6d   :  { %4735 = vmatprep.subr.mxu0 %v5186_v2 }
  0x6e   :  { %4736 = vmatpush3.msra.mxu0 %v1824_v30 }
  0x6f   :  { %4737 = vmatprep.subr.mxu0 %v5186_v2 }
  0x70   :  { %4738 = vmatpush3.msra.mxu0 %v1823_v31 }
  0x71   :  { %4753 = vmatprep.subr.mxu0 %v5186_v2 }
  0xd6   :  { %v230_v34 = vpop.f32.mrf.mxu0 }
  0xd7   :  { %v231_v5 = vadd.f32 %v4145_v3, %v230_v34  ;;  %v4216_v3 = vld [vmem:[%s6451_s11 + $0x28] sm:$0xff] }
  0xd8   :  { %v4543_v35 = vpop.f32.mrf.mxu0  ;;  %v5730_v36 = vpop.f32.mrf.mxu1 }
  0xda   :  { %v4554_v37 = vpop.f32.mrf.mxu1 }
  0xe0   :  { %v5732_v38 = vpop.f32.mrf.mxu0 }
  0xe2   :  { %v4565_v39 = vpop.f32.mrf.mxu0  ;;  %v5734_v40 = vpop.f32.mrf.mxu1 }
  0xe4   :  { %v4576_v41 = vpop.f32.mrf.mxu1 }
  0xe5   :  { %v4210_v41 = vld [vmem:[%s6447_s7 + $0x48] sm:$0xff] }
  0xe7   :  { %v1444_v16 = vpop.permute.xlu0 %1443 }
  0xe8   :  { %v1529_v17 = vmul.f32 %v4177_v15, %v1444_v16 }
  0xea   :  { %v5736_v42 = vpop.f32.mrf.mxu0  ;;  %v1593_v19 = vadd.f32 %v4185_v18, %v1529_v17 }
  0xec   :  { %v4587_v43 = vpop.f32.mrf.mxu0  ;;  %v5738_v44 = vpop.f32.mrf.mxu1  ;;  %v1657_v21 = vadd.f32 %v4193_v20, %v1593_v19  ;;  %v4186_v19 = vld [vmem:[%s6450_s10 + $0x1] ss:$0 sm:$0xff] }
  0xed   :  { %v4209_v43 = vld [vmem:[%s6447_s7 + $0x40] sm:$0xff] }
  0xee   :  { %v4598_v45 = vpop.f32.mrf.mxu1  ;;  %v4194_v20 = vld [vmem:[%s6452_s12 + $0x1] ss:$0 sm:$0xff] }
  0xef   :  { %v4208_v45 = vld [vmem:[%s6472_s26 + $0x58] sm:$0xff] }
  0xf0   :  { %4743 = vmatpush3.msra.mxu1 %v4208_v45  ;;  %v4224_v45 = vld [vmem:[%s6472_s26 + $0x98] sm:$0xff] }
  0xf1   :  { %4744 = vmatprep.subr.mxu1 %v5186_v2 }
  0xf4   :  { %v5740_v46 = vpop.f32.mrf.mxu0 }
  0xf6   :  { %v4609_v47 = vpop.f32.mrf.mxu0  ;;  %v5742_v48 = vpop.f32.mrf.mxu1 }
  0xf7   :  { %v4207_v47 = vld [vmem:[%s6472_s26 + $0x50] sm:$0xff] }
  0xf8   :  { %v4620_v49 = vpop.f32.mrf.mxu1  ;;  %4745 = vmatpush3.msra.mxu1 %v4207_v47  ;;  %v4223_v47 = vld [vmem:[%s6472_s26 + $0x90] sm:$0xff] }
  0xf9   :  { %v4206_v49 = vld [vmem:[%s6472_s26 + $0x48] sm:$0xff]  ;;  %4746 = vmatprep.subr.mxu1 %v5186_v2 }
  0xfa   :  { %4747 = vmatpush3.msra.mxu1 %v4206_v49  ;;  %v4222_v49 = vld [vmem:[%s6472_s26 + $0x88] sm:$0xff] }
  0xfb   :  { %4748 = vmatprep.subr.mxu1 %v5186_v2 }
  0xfe   :  { %v910_v50 = vpop.f32.mrf.mxu0 }
  0xff   :  { %v911_v6 = vadd.f32 %v4161_v4, %v910_v50  ;;  %v4205_v50 = vld [vmem:[%s6472_s26 + $0x40] sm:$0xff] }
 0x100   :  { %v4631_v51 = vpop.f32.mrf.mxu0  ;;  %v5744_v52 = vpop.f32.mrf.mxu1  ;;  %4749 = vmatpush3.msra.mxu1 %v4205_v50  ;;  %v4215_v4 = vld [vmem:[%s6451_s11 + $0x20] sm:$0xff] }
 0x101   :  { %4764 = vmatprep.subr.mxu1 %v5186_v2  ;;  %v4221_v50 = vld [vmem:[%s6472_s26 + $0x80] sm:$0xff] }
 0x102   :  { %v4642_v53 = vpop.f32.mrf.mxu1 }
 0x108   :  { %v5746_v54 = vpop.f32.mrf.mxu0 }
 0x10a   :  { %v4653_v55 = vpop.f32.mrf.mxu0  ;;  %v5748_v56 = vpop.f32.mrf.mxu1 }
 0x10c   :  { %v4664_v57 = vpop.f32.mrf.mxu1 }
 0x112   :  { %v5750_v58 = vpop.f32.mrf.mxu0 }
 0x114   :  { %v4675_v59 = vpop.f32.mrf.mxu0  ;;  %v5752_v60 = vpop.f32.mrf.mxu1 }
 0x115   :  { %v1426_v59 = vld [vmem:[%s6477_s28 + $0x8] sm:$0xff] }
 0x116   :  { %v4686_v61 = vpop.f32.mrf.mxu1 }
 0x117   :  { %v4218_v61 = vld [vmem:[%s6451_s11 + $0x38] sm:$0xff] }
 0x11c   :  { %v5754_v62 = vpop.f32.mrf.mxu0 }
 0x11e   :  { %v4697_v63 = vpop.f32.mrf.mxu0  ;;  %v5756_v0 = vpop.f32.mrf.mxu1 }
 0x120   :  { %v4708_v1 = vpop.f32.mrf.mxu1 }
 0x121   :  { %v4217_v1 = vld [vmem:[%s6451_s11 + $0x30] sm:$0xff] }
 0x127   :  { %v1744_v7 = vpop.f32.mrf.mxu0  ;;  %v1818_v8 = vpop.f32.mrf.mxu1 }
 0x128   :  { %v1745_v9 = vadd.f32 %v1744_v7, %v231_v5  ;;  %v1819_v10 = vadd.f32 %v1818_v8, %v911_v6  ;;  %v4162_v5 = vld [vmem:[%s6448_s8 + $0x1] ss:$0 sm:$0xff] }
 0x129   :  { %v4719_v11 = vpop.f32.mrf.mxu0  ;;  %v4730_v14 = vpop.f32.mrf.mxu1  ;;  %v984_v6 = vadd.f32 %v4162_v5, %v5744_v52  ;;  %v4178_v52 = vld [vmem:[%s6449_s9 + $0x1] ss:$0 sm:$0xff]  ;;  %v4163_v5 = vld [vmem:[%s6448_s8 + $0x2] ss:$0 sm:$0xff] }
 0x12a   :  { %v1748_v12 = vmax.f32 %v1745_v9, 0.0  ;;  %v1822_v13 = vmax.f32 %v1819_v10, 0.0  ;;  %v4146_v11 = vld [vmem:[%s6446_s6 + $0x1] ss:$0 sm:$0xff] }
 0x12c   :  { %1909 = vrot.lane.b32.xlu1 %v1822_v13, %s5189_s23  ;;  %4740 = vmatmul.mubr.msk.f32.vlgmr.msra.gmra.mxu0 %vm160_vm0, %v1748_v12  ;;  %v304_v12 = vadd.f32 %v4146_v11, %v5730_v36  ;;  %v4147_v11 = vld [vmem:[%s6446_s6 + $0x2] ss:$0 sm:$0xff] }
 0x12d   :  { %4761 = vmatprep.mubr.msk.f32.mxu0 %vm5187_vm1, %v5186_v2  ;;  %4754 = vmatpush3.msra.mxu0 %v4212_v32  ;;  %v4228_v32 = vld [vmem:[%s6447_s7 + $0x98] sm:$0xff] }
 0x12e   :  { %4755 = vmatprep.subr.mxu0 %v5186_v2 }
 0x12f   :  { %4756 = vmatpush3.msra.mxu0 %v4211_v33  ;;  %v4227_v33 = vld [vmem:[%s6447_s7 + $0x90] sm:$0xff] }
 0x130   :  { %4757 = vmatprep.subr.mxu0 %v5186_v2 }
 0x131   :  { %4758 = vmatpush3.msra.mxu0 %v4210_v41  ;;  %v4226_v41 = vld [vmem:[%s6447_s7 + $0x88] sm:$0xff] }
 0x132   :  { %4759 = vmatprep.subr.mxu0 %v5186_v2 }
 0x133   :  { %4760 = vmatpush3.msra.mxu0 %v4209_v43  ;;  %v4225_v43 = vld [vmem:[%s6447_s7 + $0x80] sm:$0xff] }
 0x134   :  { %4775 = vmatprep.subr.mxu0 %v5186_v2 }
 0x19e   :  { %v1910_v34 = vpop.permute.xlu1 %1909 }
 0x1ec   :  { %v1896_v22 = vpop.f32.mrf.mxu0 }
 0x1ed   :  { %v1900_v23 = vadd.f32 %v1896_v22, %v1657_v21 }
 0x1ee   :  { %v4741_v24 = vpop.f32.mrf.mxu0 }
 0x1ef   :  { %5010 = vtanh.f32 %v1900_v23  ;;  %v4204_v26 = vmul.f32 -1.442695, %v1900_v23 }
 0x1f1   :  { %5012 = vpow2.f32 %v4204_v26 }
 0x1fc   :  { %v5011_v25 = vpop.eup %5010 }
 0x1fd   :  { %1914 = vrot.lane.b32.xlu0 %v5011_v25, %s5190_s29 }
 0x1fe   :  { %v5013_v27 = vpop.eup %5012 }
 0x1ff   :  { %v1904_v28 = vadd.f32 1.0, %v5013_v27 }
 0x201   :  { %5014 = vrcp.f32 %v1904_v28 }
 0x20e   :  { %v5015_v29 = vpop.eup %5014 }
 0x20f   :  { %v1912_v35 = vmul.f32 %v5015_v29, %v1910_v34 }
 0x26f   :  { %v1915_v30 = vpop.permute.xlu0 %1914 }
 0x270   :  { %v1917_v31 = vmul.f32 %v5015_v29, %v1915_v30 }
 0x272   :  { %1919 = vrot.lane.b32.xlu1 %v1917_v31, %s5189_s23 }
 0x2e4   :  { %v1920_v37 = vpop.permute.xlu1 %1919 }
 0x2e5   :  { %v1922_v39 = vadd.f32 %v1920_v37, %v1912_v35 }
 0x2e7   :  { %5016 = vtanh.f32 %v1922_v39 }
 0x2f4   :  { %v5017_v51 = vpop.eup %5016 }
 0x2f5   :  { %1925 = vrot.lane.b32.xlu0 %v5017_v51, %s5190_s29 }
 0x2f9   :  { %1935 = vrot.lane.b32.xlu0 %v1922_v39, %s5191_s1 }
 0x367   :  { %v1926_v53 = vpop.permute.xlu0 %1925 }
 0x368   :  { %v1928_v55 = vmul.f32 %v5015_v29, %v1926_v53 }
 0x36a   :  { %1930 = vrot.lane.b32.xlu1 %v1928_v55, %s5189_s23 }
 0x36b   :  { %v1936_v57 = vpop.permute.xlu0 %1935 }
 0x36c   :  { %1938 = vst.msk [vmem:[#allocation9] sm:$0xff] %vm160_vm0, %v1936_v57  ;;  %4762 = vmatmul.mubr.msk.f32.vlgmr.msra.gmra.mxu0 %vm160_vm0, %v1936_v57 }
 0x36d   :  { %4783 = vmatprep.mubr.msk.f32.mxu0 %vm5187_vm1, %v5186_v2  ;;  %4776 = vmatpush3.msra.mxu0 %v4224_v45  ;;  %v4238_v45 = vld [vmem:[%s6472_s26 + $0xc8] sm:$0xff] }
 0x36e   :  { %1448 = vperm.xlu1 %5009, %v1426_v59   ;;  %4777 = vmatprep.subr.mxu0 %v5186_v2  ;;  %v1427_v59 = vld [vmem:[%s6477_s28 + $0x10] sm:$0xff] }
 0x36f   :  { %4778 = vmatpush3.msra.mxu0 %v4223_v47  ;;  %v4237_v47 = vld [vmem:[%s6472_s26 + $0xc0] sm:$0xff] }
 0x370   :  { %4779 = vmatprep.subr.mxu0 %v5186_v2 }
 0x371   :  { %4780 = vmatpush3.msra.mxu0 %v4222_v49 }
 0x372   :  { %4781 = vmatprep.subr.mxu0 %v5186_v2 }
 0x373   :  { %4782 = vmatpush3.msra.mxu0 %v4221_v50 }
 0x374   :  { %4797 = vmatprep.subr.mxu0 %v5186_v2 }
 0x3dc   :  { %v1931_v63 = vpop.permute.xlu1 %1930 }
 0x3dd   :  { %1933 = vst.msk [vmem:[#allocation7] sm:$0xff] %vm160_vm0, %v1931_v63  ;;  %4751 = vmatmul.mubr.msk.f32.vlgmr.msra.gmra.mxu1 %vm160_vm0, %v1931_v63 }
 0x3de   :  { %4765 = vmatpush3.msra.mxu1 %v4218_v61  ;;  %4772 = vmatprep.mubr.msk.f32.mxu1 %vm5187_vm1, %v5186_v2  ;;  %v4234_v61 = vld [vmem:[%s6451_s11 + $0x58] sm:$0xff] }
 0x3df   :  { %4766 = vmatprep.subr.mxu1 %v5186_v2 }
 0x3e0   :  { %4767 = vmatpush3.msra.mxu1 %v4217_v1  ;;  %v4233_v1 = vld [vmem:[%s6451_s11 + $0x50] sm:$0xff] }
 0x3e1   :  { %4768 = vmatprep.subr.mxu1 %v5186_v2 }
 0x3e2   :  { %4769 = vmatpush3.msra.mxu1 %v4216_v3  ;;  %v4232_v3 = vld [vmem:[%s6451_s11 + $0x48] sm:$0xff] }
 0x3e3   :  { %4770 = vmatprep.subr.mxu1 %v5186_v2 }
 0x3e4   :  { %4771 = vmatpush3.msra.mxu1 %v4215_v4  ;;  %v4231_v4 = vld [vmem:[%s6451_s11 + $0x40] sm:$0xff] }
 0x3e5   :  { %4786 = vmatprep.subr.mxu1 %v5186_v2 }
 0x3e9   :  { %v1449_v17 = vpop.permute.xlu1 %1448 }
 0x3ea   :  { %v1530_v18 = vmul.f32 %v4178_v52, %v1449_v17 }
 0x3ec   :  { %v1594_v36 = vadd.f32 %v4186_v19, %v1530_v18  ;;  %v4187_v18 = vld [vmem:[%s6450_s10 + $0x2] ss:$0 sm:$0xff] }
 0x3ed   :  { %v4195_v19 = vld [vmem:[%s6452_s12 + $0x2] ss:$0 sm:$0xff] }
 0x3ee   :  { %v1658_v21 = vadd.f32 %v4194_v20, %v1594_v36 }
 0x42c   :  { %v2090_v7 = vpop.f32.mrf.mxu0 }
 0x42d   :  { %v2091_v8 = vadd.f32 %v2090_v7, %v984_v6  ;;  %v1057_v6 = vadd.f32 %v4163_v5, %v5746_v54  ;;  %v4179_v54 = vld [vmem:[%s6449_s9 + $0x2] ss:$0 sm:$0xff] }
 0x42e   :  { %v4763_v9 = vpop.f32.mrf.mxu0 }
 0x42f   :  { %v2094_v10 = vmax.f32 %v2091_v8, 0.0 }
 0x431   :  { %2182 = vrot.lane.b32.xlu1 %v2094_v10, %s5189_s23 }
 0x49d   :  { %v2017_v13 = vpop.f32.mrf.mxu1 }
 0x49e   :  { %v2018_v14 = vadd.f32 %v2017_v13, %v304_v12  ;;  %v377_v12 = vadd.f32 %v4147_v11, %v5732_v38 }
 0x49f   :  { %v4752_v15 = vpop.f32.mrf.mxu1 }
 0x4a0   :  { %v2021_v16 = vmax.f32 %v2018_v14, 0.0 }
 0x4a2   :  { %4773 = vmatmul.mubr.msk.f32.vlgmr.msra.gmra.mxu1 %vm160_vm0, %v2021_v16 }
 0x4a3   :  { %4794 = vmatprep.mubr.msk.f32.mxu1 %vm5187_vm1, %v5186_v2  ;;  %4787 = vmatpush3.msra.mxu1 %v4228_v32  ;;  %v2183_v34 = vpop.permute.xlu1 %2182 }
 0x4a4   :  { %4788 = vmatprep.subr.mxu1 %v5186_v2 }
 0x4a5   :  { %4789 = vmatpush3.msra.mxu1 %v4227_v33 }
 0x4a6   :  { %4790 = vmatprep.subr.mxu1 %v5186_v2 }
 0x4a7   :  { %4791 = vmatpush3.msra.mxu1 %v4226_v41  ;;  %v4240_v41 = vld [vmem:[%s6472_s26 + $0xd8] sm:$0xff] }
 0x4a8   :  { %4792 = vmatprep.subr.mxu1 %v5186_v2 }
 0x4a9   :  { %4793 = vmatpush3.msra.mxu1 %v4225_v43  ;;  %v4239_v43 = vld [vmem:[%s6472_s26 + $0xd0] sm:$0xff] }
 0x4aa   :  { %4808 = vmatprep.subr.mxu1 %v5186_v2 }
 0x562   :  { %v2169_v22 = vpop.f32.mrf.mxu1 }
 0x563   :  { %v2173_v23 = vadd.f32 %v2169_v22, %v1658_v21 }
 0x564   :  { %v4774_v24 = vpop.f32.mrf.mxu1 }
 0x565   :  { %5018 = vtanh.f32 %v2173_v23  ;;  %v4220_v26 = vmul.f32 -1.442695, %v2173_v23 }
 0x567   :  { %5020 = vpow2.f32 %v4220_v26 }
 0x572   :  { %v5019_v25 = vpop.eup %5018 }
 0x573   :  { %2187 = vrot.lane.b32.xlu0 %v5019_v25, %s5190_s29 }
 0x574   :  { %v5021_v27 = vpop.eup %5020 }
 0x575   :  { %v2177_v28 = vadd.f32 1.0, %v5021_v27 }
 0x577   :  { %5022 = vrcp.f32 %v2177_v28 }
 0x584   :  { %v5023_v29 = vpop.eup %5022 }
 0x585   :  { %v2185_v35 = vmul.f32 %v5023_v29, %v2183_v34 }
 0x5e5   :  { %v2188_v30 = vpop.permute.xlu0 %2187 }
 0x5e6   :  { %v2190_v31 = vmul.f32 %v5023_v29, %v2188_v30  ;;  %v4244_v30 = vld [vmem:[%s6447_s7 + $0xd8] sm:$0xff] }
 0x5e8   :  { %2192 = vrot.lane.b32.xlu0 %v2190_v31, %s5189_s23  ;;  %v4243_v31 = vld [vmem:[%s6447_s7 + $0xd0] sm:$0xff] }
 0x65a   :  { %v2193_v37 = vpop.permute.xlu0 %2192 }
 0x65b   :  { %v2195_v39 = vadd.f32 %v2193_v37, %v2185_v35  ;;  %v4242_v37 = vld [vmem:[%s6447_s7 + $0xc8] sm:$0xff] }
 0x65d   :  { %5024 = vtanh.f32 %v2195_v39 }
 0x66a   :  { %v5025_v51 = vpop.eup %5024 }
 0x66b   :  { %2198 = vrot.lane.b32.xlu1 %v5025_v51, %s5190_s29 }
 0x66f   :  { %2209 = vrot.lane.b32.xlu1 %v2195_v39, %s5191_s1  ;;  %v4241_v39 = vld [vmem:[%s6447_s7 + $0xc0] sm:$0xff] }
 0x6dd   :  { %v2199_v53 = vpop.permute.xlu1 %2198 }
 0x6de   :  { %v2201_v55 = vmul.f32 %v5023_v29, %v2199_v53 }
 0x6e0   :  { %2203 = vrot.lane.b32.xlu0 %v2201_v55, %s5189_s23  ;;  %v1428_v55 = vld [vmem:[%s6477_s28 + $0x18] sm:$0xff] }
 0x6e1   :  { %v2210_v57 = vpop.permute.xlu1 %2209 }
 0x6e2   :  { %2213 = vst.msk [vmem:[#allocation9 + $0x8] sm:$0xff] %vm160_vm0, %v2210_v57  ;;  %4795 = vmatmul.mubr.msk.f32.vlgmr.msra.gmra.mxu1 %vm160_vm0, %v2210_v57  ;;  %v4250_v57 = vld [vmem:[%s6451_s11 + $0x78] sm:$0xff] }
 0x6e3   :  { %4816 = vmatprep.mubr.msk.f32.mxu1 %vm5187_vm1, %v5186_v2  ;;  %4809 = vmatpush3.msra.mxu1 %v4240_v41 }
 0x6e4   :  { %1453 = vperm.xlu0 %5008, %v1427_v59   ;;  %4810 = vmatprep.subr.mxu1 %v5186_v2 }
 0x6e5   :  { %4811 = vmatpush3.msra.mxu1 %v4239_v43 }
 0x6e6   :  { %4812 = vmatprep.subr.mxu1 %v5186_v2 }
 0x6e7   :  { %4813 = vmatpush3.msra.mxu1 %v4238_v45 }
 0x6e8   :  { %4814 = vmatprep.subr.mxu1 %v5186_v2 }
 0x6e9   :  { %4815 = vmatpush3.msra.mxu1 %v4237_v47 }
 0x6ea   :  { %4830 = vmatprep.subr.mxu1 %v5186_v2 }
 0x752   :  { %v2204_v63 = vpop.permute.xlu0 %2203 }
 0x753   :  { %2207 = vst.msk [vmem:[#allocation7 + $0x8] sm:$0xff] %vm160_vm0, %v2204_v63  ;;  %4784 = vmatmul.mubr.msk.f32.vlgmr.msra.gmra.mxu0 %vm160_vm0, %v2204_v63  ;;  %v4248_v63 = vld [vmem:[%s6451_s11 + $0x68] sm:$0xff] }
 0x754   :  { %4798 = vmatpush3.msra.mxu0 %v4234_v61  ;;  %4805 = vmatprep.mubr.msk.f32.mxu0 %vm5187_vm1, %v5186_v2  ;;  %v4249_v61 = vld [vmem:[%s6451_s11 + $0x70] sm:$0xff] }
 0x755   :  { %4799 = vmatprep.subr.mxu0 %v5186_v2 }
 0x756   :  { %4800 = vmatpush3.msra.mxu0 %v4233_v1  ;;  %v4247_v1 = vld [vmem:[%s6451_s11 + $0x60] sm:$0xff] }
 0x757   :  { %4801 = vmatprep.subr.mxu0 %v5186_v2 }
 0x758   :  { %4802 = vmatpush3.msra.mxu0 %v4232_v3  ;;  %v4164_v3 = vld [vmem:[%s6448_s8 + $0x3] ss:$0 sm:$0xff] }
 0x759   :  { %4803 = vmatprep.subr.mxu0 %v5186_v2 }
 0x75a   :  { %4804 = vmatpush3.msra.mxu0 %v4231_v4  ;;  %v1130_v4 = vadd.f32 %v4164_v3, %v5748_v56  ;;  %v4180_v56 = vld [vmem:[%s6449_s9 + $0x3] ss:$0 sm:$0xff] }
 0x75b   :  { %4819 = vmatprep.subr.mxu0 %v5186_v2 }
 0x75f   :  { %v1454_v52 = vpop.permute.xlu0 %1453 }
 0x760   :  { %v1531_v17 = vmul.f32 %v4179_v54, %v1454_v52  ;;  %v4188_v54 = vld [vmem:[%s6450_s10 + $0x3] ss:$0 sm:$0xff] }
 0x761   :  { %v4196_v52 = vld [vmem:[%s6452_s12 + $0x3] ss:$0 sm:$0xff] }
 0x762   :  { %v1595_v38 = vadd.f32 %v4187_v18, %v1531_v17 }
 0x764   :  { %v1659_v36 = vadd.f32 %v4195_v19, %v1595_v38 }
 0x7a2   :  { %v2365_v7 = vpop.f32.mrf.mxu1 }
 0x7a3   :  { %v2366_v8 = vadd.f32 %v2365_v7, %v1057_v6 }
 0x7a4   :  { %v4796_v9 = vpop.f32.mrf.mxu1 }
 0x7a5   :  { %v2369_v10 = vmax.f32 %v2366_v8, 0.0  ;;  %v4148_v9 = vld [vmem:[%s6446_s6 + $0x3] ss:$0 sm:$0xff] }
 0x7a7   :  { %2457 = vrot.lane.b32.xlu0 %v2369_v10, %s5189_s23  ;;  %v450_v10 = vadd.f32 %v4148_v9, %v5734_v40 }
 0x813   :  { %v2292_v13 = vpop.f32.mrf.mxu0 }
 0x814   :  { %v2293_v14 = vadd.f32 %v2292_v13, %v377_v12 }
 0x815   :  { %v4785_v15 = vpop.f32.mrf.mxu0 }
 0x816   :  { %v2296_v16 = vmax.f32 %v2293_v14, 0.0 }
 0x818   :  { %4806 = vmatmul.mubr.msk.f32.vlgmr.msra.gmra.mxu0 %vm160_vm0, %v2296_v16 }
 0x819   :  { %4827 = vmatprep.mubr.msk.f32.mxu0 %vm5187_vm1, %v5186_v2  ;;  %4820 = vmatpush3.msra.mxu0 %v4244_v30  ;;  %v2458_v32 = vpop.permute.xlu0 %2457 }
 0x81a   :  { %4821 = vmatprep.subr.mxu0 %v5186_v2 }
 0x81b   :  { %4822 = vmatpush3.msra.mxu0 %v4243_v31 }
 0x81c   :  { %4823 = vmatprep.subr.mxu0 %v5186_v2 }
 0x81d   :  { %4824 = vmatpush3.msra.mxu0 %v4242_v37  ;;  %v4254_v37 = vld [vmem:[%s6472_s26 + $0x108] sm:$0xff] }
 0x81e   :  { %4825 = vmatprep.subr.mxu0 %v5186_v2 }
 0x81f   :  { %4826 = vmatpush3.msra.mxu0 %v4241_v39  ;;  %v4253_v39 = vld [vmem:[%s6472_s26 + $0x100] sm:$0xff] }
 0x820   :  { %4841 = vmatprep.subr.mxu0 %v5186_v2 }
 0x8d8   :  { %v2444_v20 = vpop.f32.mrf.mxu0 }
 0x8d9   :  { %v2448_v21 = vadd.f32 %v2444_v20, %v1659_v36 }
 0x8da   :  { %v4807_v22 = vpop.f32.mrf.mxu0 }
 0x8db   :  { %5026 = vtanh.f32 %v2448_v21  ;;  %v4236_v24 = vmul.f32 -1.442695, %v2448_v21 }
 0x8dd   :  { %5028 = vpow2.f32 %v4236_v24 }
 0x8e8   :  { %v5027_v23 = vpop.eup %5026 }
 0x8e9   :  { %2462 = vrot.lane.b32.xlu1 %v5027_v23, %s5190_s29 }
 0x8ea   :  { %v5029_v25 = vpop.eup %5028 }
 0x8eb   :  { %v2452_v26 = vadd.f32 1.0, %v5029_v25 }
 0x8ed   :  { %5030 = vrcp.f32 %v2452_v26  ;;  %v4260_v26 = vld [vmem:[%s6447_s7 + $0x118] sm:$0xff] }
 0x8fa   :  { %v5031_v27 = vpop.eup %5030 }
 0x8fb   :  { %v2460_v33 = vmul.f32 %v5031_v27, %v2458_v32  ;;  %v4258_v32 = vld [vmem:[%s6447_s7 + $0x108] sm:$0xff] }
 0x95b   :  { %v2463_v28 = vpop.permute.xlu1 %2462 }
 0x95c   :  { %v2465_v29 = vmul.f32 %v5031_v27, %v2463_v28 }
 0x95e   :  { %2467 = vrot.lane.b32.xlu1 %v2465_v29, %s5189_s23 }
 0x9d0   :  { %v2468_v34 = vpop.permute.xlu1 %2467 }
 0x9d1   :  { %v2470_v35 = vadd.f32 %v2468_v34, %v2460_v33  ;;  %v4257_v33 = vld [vmem:[%s6447_s7 + $0x100] sm:$0xff]  ;;  %v4256_v34 = vld [vmem:[%s6472_s26 + $0x118] sm:$0xff] }
 0x9d3   :  { %5032 = vtanh.f32 %v2470_v35 }
 0x9e0   :  { %v5033_v49 = vpop.eup %5032 }
 0x9e1   :  { %2473 = vrot.lane.b32.xlu0 %v5033_v49, %s5190_s29  ;;  %v1429_v49 = vld [vmem:[%s6477_s28 + $0x20] sm:$0xff] }
 0x9e5   :  { %2484 = vrot.lane.b32.xlu0 %v2470_v35, %s5191_s1  ;;  %v4255_v35 = vld [vmem:[%s6472_s26 + $0x110] sm:$0xff] }
 0xa53   :  { %v2474_v50 = vpop.permute.xlu0 %2473 }
 0xa54   :  { %v2476_v51 = vmul.f32 %v5031_v27, %v2474_v50  ;;  %v4259_v27 = vld [vmem:[%s6447_s7 + $0x110] sm:$0xff]  ;;  %v4266_v50 = vld [vmem:[%s6451_s11 + $0x98] sm:$0xff] }
 0xa56   :  { %2478 = vrot.lane.b32.xlu1 %v2476_v51, %s5189_s23 }
 0xa57   :  { %v2485_v53 = vpop.permute.xlu0 %2484 }
 0xa58   :  { %2488 = vst.msk [vmem:[#allocation9 + $0x10] sm:$0xff] %vm160_vm0, %v2485_v53  ;;  %4828 = vmatmul.mubr.msk.f32.vlgmr.msra.gmra.mxu0 %vm160_vm0, %v2485_v53  ;;  %v4265_v53 = vld [vmem:[%s6451_s11 + $0x90] sm:$0xff] }
 0xa59   :  { %4849 = vmatprep.mubr.msk.f32.mxu0 %vm5187_vm1, %v5186_v2  ;;  %4842 = vmatpush3.msra.mxu0 %v4256_v34 }
 0xa5a   :  { %1458 = vperm.xlu1 %5009, %v1428_v55   ;;  %4843 = vmatprep.subr.mxu0 %v5186_v2  ;;  %v4264_v55 = vld [vmem:[%s6451_s11 + $0x88] sm:$0xff] }
 0xa5b   :  { %4844 = vmatpush3.msra.mxu0 %v4255_v35 }
 0xa5c   :  { %4845 = vmatprep.subr.mxu0 %v5186_v2 }
 0xa5d   :  { %4846 = vmatpush3.msra.mxu0 %v4254_v37  ;;  %v1430_v37 = vld [vmem:[%s6477_s28 + $0x28] sm:$0xff] }
 0xa5e   :  { %4847 = vmatprep.subr.mxu0 %v5186_v2 }
 0xa5f   :  { %4848 = vmatpush3.msra.mxu0 %v4253_v39  ;;  %v4282_v39 = vld [vmem:[%s6451_s11 + $0xb8] sm:$0xff] }
 0xa60   :  { %4863 = vmatprep.subr.mxu0 %v5186_v2 }
 0xac8   :  { %v2479_v59 = vpop.permute.xlu1 %2478 }
 0xac9   :  { %2482 = vst.msk [vmem:[#allocation7 + $0x10] sm:$0xff] %vm160_vm0, %v2479_v59  ;;  %4817 = vmatmul.mubr.msk.f32.vlgmr.msra.gmra.mxu1 %vm160_vm0, %v2479_v59  ;;  %v4165_v59 = vld [vmem:[%s6448_s8 + $0x4] ss:$0 sm:$0xff] }
 0xaca   :  { %4831 = vmatpush3.msra.mxu1 %v4250_v57  ;;  %4838 = vmatprep.mubr.msk.f32.mxu1 %vm5187_vm1, %v5186_v2  ;;  %v4263_v57 = vld [vmem:[%s6451_s11 + $0x80] sm:$0xff] }
 0xacb   :  { %4832 = vmatprep.subr.mxu1 %v5186_v2 }
 0xacc   :  { %4833 = vmatpush3.msra.mxu1 %v4249_v61  ;;  %v1203_v61 = vadd.f32 %v4165_v59, %v5750_v58  ;;  %v4181_v58 = vld [vmem:[%s6449_s9 + $0x4] ss:$0 sm:$0xff]  ;;  %v4150_v59 = vld [vmem:[%s6446_s6 + $0x5] ss:$0 sm:$0xff] }
 0xacd   :  { %4834 = vmatprep.subr.mxu1 %v5186_v2 }
 0xace   :  { %4835 = vmatpush3.msra.mxu1 %v4248_v63 }
 0xacf   :  { %4836 = vmatprep.subr.mxu1 %v5186_v2 }
 0xad0   :  { %4837 = vmatpush3.msra.mxu1 %v4247_v1 }
 0xad1   :  { %4852 = vmatprep.subr.mxu1 %v5186_v2 }
 0xad5   :  { %v1459_v15 = vpop.permute.xlu1 %1458 }
 0xad6   :  { %v1532_v16 = vmul.f32 %v4180_v56, %v1459_v15 }
 0xad8   :  { %v1596_v40 = vadd.f32 %v4188_v54, %v1532_v16 }
 0xada   :  { %v1660_v17 = vadd.f32 %v4196_v52, %v1596_v40 }
 0xb18   :  { %v2640_v5 = vpop.f32.mrf.mxu0 }
 0xb19   :  { %v2641_v6 = vadd.f32 %v2640_v5, %v1130_v4  ;;  %v4149_v5 = vld [vmem:[%s6446_s6 + $0x4] ss:$0 sm:$0xff] }
 0xb1a   :  { %v4829_v7 = vpop.f32.mrf.mxu0 }
 0xb1b   :  { %v2644_v8 = vmax.f32 %v2641_v6, 0.0  ;;  %v523_v6 = vadd.f32 %v4149_v5, %v5736_v42 }
 0xb1d   :  { %2732 = vrot.lane.b32.xlu1 %v2644_v8, %s5189_s23 }
 0xb89   :  { %v2567_v11 = vpop.f32.mrf.mxu1 }
 0xb8a   :  { %v2568_v12 = vadd.f32 %v2567_v11, %v450_v10 }
 0xb8b   :  { %v4818_v13 = vpop.f32.mrf.mxu1 }
 0xb8c   :  { %v2571_v14 = vmax.f32 %v2568_v12, 0.0  ;;  %v4189_v13 = vld [vmem:[%s6450_s10 + $0x4] ss:$0 sm:$0xff] }
 0xb8e   :  { %4839 = vmatmul.mubr.msk.f32.vlgmr.msra.gmra.mxu1 %vm160_vm0, %v2571_v14  ;;  %v4197_v14 = vld [vmem:[%s6452_s12 + $0x4] ss:$0 sm:$0xff] }
 0xb8f   :  { %4860 = vmatprep.mubr.msk.f32.mxu1 %vm5187_vm1, %v5186_v2  ;;  %4853 = vmatpush3.msra.mxu1 %v4260_v26  ;;  %v2733_v28 = vpop.permute.xlu1 %2732  ;;  %v4274_v26 = vld [vmem:[%s6447_s7 + $0x148] sm:$0xff] }
 0xb90   :  { %4854 = vmatprep.subr.mxu1 %v5186_v2 }
 0xb91   :  { %4855 = vmatpush3.msra.mxu1 %v4259_v27  ;;  %v4273_v27 = vld [vmem:[%s6447_s7 + $0x140] sm:$0xff] }
 0xb92   :  { %4856 = vmatprep.subr.mxu1 %v5186_v2 }
 0xb93   :  { %4857 = vmatpush3.msra.mxu1 %v4258_v32 }
 0xb94   :  { %4858 = vmatprep.subr.mxu1 %v5186_v2 }
 0xb95   :  { %4859 = vmatpush3.msra.mxu1 %v4257_v33 }
 0xb96   :  { %4874 = vmatprep.subr.mxu1 %v5186_v2 }
 0xc4e   :  { %v2719_v18 = vpop.f32.mrf.mxu1 }
 0xc4f   :  { %v2723_v38 = vadd.f32 %v2719_v18, %v1660_v17 }
 0xc50   :  { %v4840_v19 = vpop.f32.mrf.mxu1 }
 0xc51   :  { %5034 = vtanh.f32 %v2723_v38  ;;  %v4252_v20 = vmul.f32 -1.442695, %v2723_v38 }
 0xc53   :  { %5036 = vpow2.f32 %v4252_v20  ;;  %v4276_v20 = vld [vmem:[%s6447_s7 + $0x158] sm:$0xff] }
 0xc5e   :  { %v5035_v36 = vpop.eup %5034 }
 0xc5f   :  { %2737 = vrot.lane.b32.xlu0 %v5035_v36, %s5190_s29 }
 0xc60   :  { %v5037_v21 = vpop.eup %5036 }
 0xc61   :  { %v2727_v22 = vadd.f32 1.0, %v5037_v21  ;;  %v4275_v21 = vld [vmem:[%s6447_s7 + $0x150] sm:$0xff] }
 0xc63   :  { %5038 = vrcp.f32 %v2727_v22 }
 0xc70   :  { %v5039_v23 = vpop.eup %5038 }
 0xc71   :  { %v2735_v29 = vmul.f32 %v5039_v23, %v2733_v28  ;;  %v4272_v28 = vld [vmem:[%s6472_s26 + $0x158] sm:$0xff] }
 0xcd1   :  { %v2738_v24 = vpop.permute.xlu0 %2737 }
 0xcd2   :  { %v2740_v25 = vmul.f32 %v5039_v23, %v2738_v24 }
 0xcd4   :  { %2742 = vrot.lane.b32.xlu0 %v2740_v25, %s5189_s23 }
 0xd46   :  { %v2743_v30 = vpop.permute.xlu0 %2742 }
 0xd47   :  { %v2745_v31 = vadd.f32 %v2743_v30, %v2735_v29  ;;  %v4271_v29 = vld [vmem:[%s6472_s26 + $0x150] sm:$0xff]  ;;  %v4270_v30 = vld [vmem:[%s6472_s26 + $0x148] sm:$0xff] }
 0xd49   :  { %5040 = vtanh.f32 %v2745_v31 }
 0xd56   :  { %v5041_v41 = vpop.eup %5040 }
 0xd57   :  { %2748 = vrot.lane.b32.xlu1 %v5041_v41, %s5190_s29 }
 0xd5b   :  { %2759 = vrot.lane.b32.xlu1 %v2745_v31, %s5191_s1  ;;  %v4269_v31 = vld [vmem:[%s6472_s26 + $0x140] sm:$0xff] }
 0xdc9   :  { %v2749_v43 = vpop.permute.xlu1 %2748 }
 0xdca   :  { %v2751_v45 = vmul.f32 %v5039_v23, %v2749_v43  ;;  %v4281_v43 = vld [vmem:[%s6451_s11 + $0xb0] sm:$0xff] }
 0xdcc   :  { %2753 = vrot.lane.b32.xlu0 %v2751_v45, %s5189_s23  ;;  %v4280_v45 = vld [vmem:[%s6451_s11 + $0xa8] sm:$0xff] }
 0xdcd   :  { %v2760_v47 = vpop.permute.xlu1 %2759 }
 0xdce   :  { %2763 = vst.msk [vmem:[#allocation9 + $0x18] sm:$0xff] %vm160_vm0, %v2760_v47  ;;  %4861 = vmatmul.mubr.msk.f32.vlgmr.msra.gmra.mxu1 %vm160_vm0, %v2760_v47  ;;  %v4279_v47 = vld [vmem:[%s6451_s11 + $0xa0] sm:$0xff] }
 0xdcf   :  { %4882 = vmatprep.mubr.msk.f32.mxu1 %vm5187_vm1, %v5186_v2  ;;  %4875 = vmatpush3.msra.mxu1 %v4272_v28  ;;  %v1431_v28 = vld [vmem:[%s6477_s28 + $0x30] sm:$0xff] }
 0xdd0   :  { %1463 = vperm.xlu0 %5008, %v1429_v49   ;;  %4876 = vmatprep.subr.mxu1 %v5186_v2  ;;  %v4166_v49 = vld [vmem:[%s6448_s8 + $0x5] ss:$0 sm:$0xff] }
 0xdd1   :  { %4877 = vmatpush3.msra.mxu1 %v4271_v29  ;;  %v4298_v29 = vld [vmem:[%s6451_s11 + $0xd8] sm:$0xff] }
 0xdd2   :  { %4878 = vmatprep.subr.mxu1 %v5186_v2 }
 0xdd3   :  { %4879 = vmatpush3.msra.mxu1 %v4270_v30 }
 0xdd4   :  { %4880 = vmatprep.subr.mxu1 %v5186_v2 }
 0xdd5   :  { %4881 = vmatpush3.msra.mxu1 %v4269_v31  ;;  %v4297_v31 = vld [vmem:[%s6451_s11 + $0xd0] sm:$0xff] }
 0xdd6   :  { %4896 = vmatprep.subr.mxu1 %v5186_v2 }
 0xe3e   :  { %v2754_v51 = vpop.permute.xlu0 %2753 }
 0xe3f   :  { %2757 = vst.msk [vmem:[#allocation7 + $0x18] sm:$0xff] %vm160_vm0, %v2754_v51  ;;  %4850 = vmatmul.mubr.msk.f32.vlgmr.msra.gmra.mxu0 %vm160_vm0, %v2754_v51 }
 0xe40   :  { %4864 = vmatpush3.msra.mxu0 %v4266_v50  ;;  %4871 = vmatprep.mubr.msk.f32.mxu0 %vm5187_vm1, %v5186_v2  ;;  %v1276_v50 = vadd.f32 %v4166_v49, %v5752_v60  ;;  %v4182_v60 = vld [vmem:[%s6449_s9 + $0x5] ss:$0 sm:$0xff] }
 0xe41   :  { %4865 = vmatprep.subr.mxu0 %v5186_v2 }
 0xe42   :  { %4866 = vmatpush3.msra.mxu0 %v4265_v53 }
 0xe43   :  { %4867 = vmatprep.subr.mxu0 %v5186_v2 }
 0xe44   :  { %4868 = vmatpush3.msra.mxu0 %v4264_v55 }
 0xe45   :  { %4869 = vmatprep.subr.mxu0 %v5186_v2 }
 0xe46   :  { %4870 = vmatpush3.msra.mxu0 %v4263_v57 }
 0xe47   :  { %4885 = vmatprep.subr.mxu0 %v5186_v2 }
 0xe4b   :  { %v1464_v11 = vpop.permute.xlu0 %1463 }
 0xe4c   :  { %v1533_v12 = vmul.f32 %v4181_v58, %v1464_v11 }
 0xe4e   :  { %v1597_v42 = vadd.f32 %v4189_v13, %v1533_v12 }
 0xe50   :  { %v1661_v56 = vadd.f32 %v4197_v14, %v1597_v42 }
 0xe8e   :  { %v2915_v63 = vpop.f32.mrf.mxu1 }
 0xe8f   :  { %v2916_v1 = vadd.f32 %v2915_v63, %v1203_v61  ;;  %v596_v61 = vadd.f32 %v4150_v59, %v5738_v44  ;;  %v4191_v59 = vld [vmem:[%s6450_s10 + $0x6] ss:$0 sm:$0xff] }
 0xe90   :  { %v4862_v3 = vpop.f32.mrf.mxu1 }
 0xe91   :  { %v2919_v4 = vmax.f32 %v2916_v1, 0.0 }
 0xe93   :  { %3007 = vrot.lane.b32.xlu0 %v2919_v4, %s5189_s23 }
 0xeff   :  { %v2842_v7 = vpop.f32.mrf.mxu0 }
 0xf00   :  { %v2843_v8 = vadd.f32 %v2842_v7, %v523_v6  ;;  %v4190_v7 = vld [vmem:[%s6450_s10 + $0x5] ss:$0 sm:$0xff] }
 0xf01   :  { %v4851_v9 = vpop.f32.mrf.mxu0 }
 0xf02   :  { %v2846_v10 = vmax.f32 %v2843_v8, 0.0  ;;  %v4198_v8 = vld [vmem:[%s6452_s12 + $0x5] ss:$0 sm:$0xff] }
 0xf04   :  { %4872 = vmatmul.mubr.msk.f32.vlgmr.msra.gmra.mxu0 %vm160_vm0, %v2846_v10 }
 0xf05   :  { %4893 = vmatprep.mubr.msk.f32.mxu0 %vm5187_vm1, %v5186_v2  ;;  %4886 = vmatpush3.msra.mxu0 %v4276_v20  ;;  %v3008_v22 = vpop.permute.xlu0 %3007  ;;  %v4288_v20 = vld [vmem:[%s6472_s26 + $0x198] sm:$0xff] }
 0xf06   :  { %4887 = vmatprep.subr.mxu0 %v5186_v2 }
 0xf07   :  { %4888 = vmatpush3.msra.mxu0 %v4275_v21  ;;  %v4287_v21 = vld [vmem:[%s6472_s26 + $0x190] sm:$0xff] }
 0xf08   :  { %4889 = vmatprep.subr.mxu0 %v5186_v2 }
 0xf09   :  { %4890 = vmatpush3.msra.mxu0 %v4274_v26 }
 0xf0a   :  { %4891 = vmatprep.subr.mxu0 %v5186_v2 }
 0xf0b   :  { %4892 = vmatpush3.msra.mxu0 %v4273_v27 }
 0xf0c   :  { %4907 = vmatprep.subr.mxu0 %v5186_v2 }
 0xfc4   :  { %v2994_v15 = vpop.f32.mrf.mxu0 }
 0xfc5   :  { %v2998_v16 = vadd.f32 %v2994_v15, %v1661_v56 }
 0xfc6   :  { %v4873_v54 = vpop.f32.mrf.mxu0 }
 0xfc7   :  { %5042 = vtanh.f32 %v2998_v16  ;;  %v4268_v52 = vmul.f32 -1.442695, %v2998_v16  ;;  %v4292_v54 = vld [vmem:[%s6447_s7 + $0x198] sm:$0xff] }
 0xfc9   :  { %5044 = vpow2.f32 %v4268_v52 }
 0xfd4   :  { %v5043_v40 = vpop.eup %5042 }
 0xfd5   :  { %3012 = vrot.lane.b32.xlu1 %v5043_v40, %s5190_s29  ;;  %v4291_v40 = vld [vmem:[%s6447_s7 + $0x190] sm:$0xff] }
 0xfd6   :  { %v5045_v17 = vpop.eup %5044 }
 0xfd7   :  { %v3002_v18 = vadd.f32 1.0, %v5045_v17 }
 0xfd9   :  { %5046 = vrcp.f32 %v3002_v18 }
 0xfe6   :  { %v5047_v38 = vpop.eup %5046 }
 0xfe7   :  { %v3010_v23 = vmul.f32 %v5047_v38, %v3008_v22  ;;  %v4286_v22 = vld [vmem:[%s6472_s26 + $0x188] sm:$0xff] }
0x1047   :  { %v3013_v19 = vpop.permute.xlu1 %3012 }
0x1048   :  { %v3015_v36 = vmul.f32 %v5047_v38, %v3013_v19  ;;  %v4290_v19 = vld [vmem:[%s6447_s7 + $0x188] sm:$0xff] }
0x104a   :  { %3017 = vrot.lane.b32.xlu1 %v3015_v36, %s5189_s23  ;;  %v4289_v36 = vld [vmem:[%s6447_s7 + $0x180] sm:$0xff] }
0x10bc   :  { %v3018_v24 = vpop.permute.xlu1 %3017 }
0x10bd   :  { %v3020_v25 = vadd.f32 %v3018_v24, %v3010_v23  ;;  %v4285_v23 = vld [vmem:[%s6472_s26 + $0x180] sm:$0xff] }
0x10bf   :  { %5048 = vtanh.f32 %v3020_v25 }
0x10cc   :  { %v5049_v32 = vpop.eup %5048 }
0x10cd   :  { %3023 = vrot.lane.b32.xlu0 %v5049_v32, %s5190_s29  ;;  %v4296_v32 = vld [vmem:[%s6451_s11 + $0xc8] sm:$0xff] }
0x10d1   :  { %3034 = vrot.lane.b32.xlu0 %v3020_v25, %s5191_s1 }
0x113f   :  { %v3024_v33 = vpop.permute.xlu0 %3023 }
0x1140   :  { %v3026_v34 = vmul.f32 %v5047_v38, %v3024_v33  ;;  %v4295_v33 = vld [vmem:[%s6451_s11 + $0xc0] sm:$0xff] }
0x1142   :  { %3028 = vrot.lane.b32.xlu1 %v3026_v34, %s5189_s23  ;;  %v4167_v34 = vld [vmem:[%s6448_s8 + $0x6] ss:$0 sm:$0xff] }
0x1143   :  { %v3035_v35 = vpop.permute.xlu0 %3034 }
0x1144   :  { %3038 = vst.msk [vmem:[#allocation9 + $0x20] sm:$0xff] %vm160_vm0, %v3035_v35  ;;  %4894 = vmatmul.mubr.msk.f32.vlgmr.msra.gmra.mxu0 %vm160_vm0, %v3035_v35  ;;  %v1349_v35 = vadd.f32 %v4167_v34, %v5754_v62  ;;  %v4183_v62 = vld [vmem:[%s6449_s9 + $0x6] ss:$0 sm:$0xff] }
0x1145   :  { %4915 = vmatprep.mubr.msk.f32.mxu0 %vm5187_vm1, %v5186_v2  ;;  %4908 = vmatpush3.msra.mxu0 %v4288_v20 }
0x1146   :  { %1468 = vperm.xlu1 %5009, %v1430_v37   ;;  %4909 = vmatprep.subr.mxu0 %v5186_v2 }
0x1147   :  { %4910 = vmatpush3.msra.mxu0 %v4287_v21  ;;  %v4313_v21 = vld [vmem:[%s6451_s11 + $0xf0] sm:$0xff] }
0x1148   :  { %4911 = vmatprep.subr.mxu0 %v5186_v2 }
0x1149   :  { %4912 = vmatpush3.msra.mxu0 %v4286_v22  ;;  %v4312_v22 = vld [vmem:[%s6451_s11 + $0xe8] sm:$0xff] }
0x114a   :  { %4913 = vmatprep.subr.mxu0 %v5186_v2 }
0x114b   :  { %4914 = vmatpush3.msra.mxu0 %v4285_v23  ;;  %v4311_v23 = vld [vmem:[%s6451_s11 + $0xe0] sm:$0xff] }
0x114c   :  { %4929 = vmatprep.subr.mxu0 %v5186_v2 }
0x11b4   :  { %v3029_v41 = vpop.permute.xlu1 %3028 }
0x11b5   :  { %3032 = vst.msk [vmem:[#allocation7 + $0x20] sm:$0xff] %vm160_vm0, %v3029_v41  ;;  %4883 = vmatmul.mubr.msk.f32.vlgmr.msra.gmra.mxu1 %vm160_vm0, %v3029_v41 }
0x11b6   :  { %4897 = vmatpush3.msra.mxu1 %v4282_v39  ;;  %4904 = vmatprep.mubr.msk.f32.mxu1 %vm5187_vm1, %v5186_v2 }
0x11b7   :  { %4898 = vmatprep.subr.mxu1 %v5186_v2 }
0x11b8   :  { %4899 = vmatpush3.msra.mxu1 %v4281_v43 }
0x11b9   :  { %4900 = vmatprep.subr.mxu1 %v5186_v2 }
0x11ba   :  { %4901 = vmatpush3.msra.mxu1 %v4280_v45  ;;  %v4151_v45 = vld [vmem:[%s6446_s6 + $0x6] ss:$0 sm:$0xff] }
0x11bb   :  { %4902 = vmatprep.subr.mxu1 %v5186_v2 }
0x11bc   :  { %4903 = vmatpush3.msra.mxu1 %v4279_v47  ;;  %v669_v47 = vadd.f32 %v4151_v45, %v5740_v46 }
0x11bd   :  { %4918 = vmatprep.subr.mxu1 %v5186_v2 }
0x11c1   :  { %v1469_v5 = vpop.permute.xlu1 %1468 }
0x11c2   :  { %v1534_v6 = vmul.f32 %v4182_v60, %v1469_v5 }
0x11c4   :  { %v1598_v44 = vadd.f32 %v4190_v7, %v1534_v6 }
0x11c6   :  { %v1662_v9 = vadd.f32 %v4198_v8, %v1598_v44 }
0x1204   :  { %v3190_v51 = vpop.f32.mrf.mxu0 }
0x1205   :  { %v3191_v53 = vadd.f32 %v3190_v51, %v1276_v50 }
0x1206   :  { %v4895_v55 = vpop.f32.mrf.mxu0 }
0x1207   :  { %v3194_v57 = vmax.f32 %v3191_v53, 0.0 }
0x1209   :  { %3282 = vrot.lane.b32.xlu1 %v3194_v57, %s5189_s23 }
0x1275   :  { %v3117_v63 = vpop.f32.mrf.mxu1 }
0x1276   :  { %v3118_v1 = vadd.f32 %v3117_v63, %v596_v61  ;;  %v4199_v61 = vld [vmem:[%s6452_s12 + $0x6] ss:$0 sm:$0xff] }
0x1277   :  { %v4884_v3 = vpop.f32.mrf.mxu1 }
0x1278   :  { %v3121_v4 = vmax.f32 %v3118_v1, 0.0 }
0x127a   :  { %4905 = vmatmul.mubr.msk.f32.vlgmr.msra.gmra.mxu1 %vm160_vm0, %v3121_v4 }
0x127b   :  { %4926 = vmatprep.mubr.msk.f32.mxu1 %vm5187_vm1, %v5186_v2  ;;  %4919 = vmatpush3.msra.mxu1 %v4292_v54  ;;  %v3283_v52 = vpop.permute.xlu1 %3282  ;;  %v4302_v54 = vld [vmem:[%s6472_s26 + $0x1c8] sm:$0xff] }
0x127c   :  { %4920 = vmatprep.subr.mxu1 %v5186_v2 }
0x127d   :  { %4921 = vmatpush3.msra.mxu1 %v4291_v40  ;;  %v4301_v40 = vld [vmem:[%s6472_s26 + $0x1c0] sm:$0xff] }
0x127e   :  { %4922 = vmatprep.subr.mxu1 %v5186_v2 }
0x127f   :  { %4923 = vmatpush3.msra.mxu1 %v4290_v19  ;;  %v1432_v19 = vld [vmem:[%s6477_s28 + $0x38] sm:$0xff] }
0x1280   :  { %4924 = vmatprep.subr.mxu1 %v5186_v2 }
0x1281   :  { %4925 = vmatpush3.msra.mxu1 %v4289_v36  ;;  %v4314_v36 = vld [vmem:[%s6451_s11 + $0xf8] sm:$0xff] }
0x1282   :  { %4940 = vmatprep.subr.mxu1 %v5186_v2 }
0x133a   :  { %v3269_v10 = vpop.f32.mrf.mxu1 }
0x133b   :  { %v3273_v58 = vadd.f32 %v3269_v10, %v1662_v9  ;;  %v4308_v10 = vld [vmem:[%s6447_s7 + $0x1d8] sm:$0xff] }
0x133c   :  { %v4906_v11 = vpop.f32.mrf.mxu1 }
0x133d   :  { %5050 = vtanh.f32 %v3273_v58  ;;  %v4284_v13 = vmul.f32 -1.442695, %v3273_v58  ;;  %v4307_v58 = vld [vmem:[%s6447_s7 + $0x1d0] sm:$0xff] }
0x133f   :  { %5052 = vpow2.f32 %v4284_v13 }
0x134a   :  { %v5051_v12 = vpop.eup %5050 }
0x134b   :  { %3287 = vrot.lane.b32.xlu0 %v5051_v12, %s5190_s29 }
0x134c   :  { %v5053_v42 = vpop.eup %5052 }
0x134d   :  { %v3277_v14 = vadd.f32 1.0, %v5053_v42 }
0x134f   :  { %5054 = vrcp.f32 %v3277_v14  ;;  %v4306_v14 = vld [vmem:[%s6447_s7 + $0x1c8] sm:$0xff] }
0x135c   :  { %v5055_v56 = vpop.eup %5054 }
0x135d   :  { %v3285_v17 = vmul.f32 %v5055_v56, %v3283_v52 }
0x13bd   :  { %v3288_v15 = vpop.permute.xlu0 %3287 }
0x13be   :  { %v3290_v16 = vmul.f32 %v5055_v56, %v3288_v15  ;;  %v4304_v15 = vld [vmem:[%s6472_s26 + $0x1d8] sm:$0xff] }
0x13c0   :  { %3292 = vrot.lane.b32.xlu0 %v3290_v16, %s5189_s23  ;;  %v4303_v16 = vld [vmem:[%s6472_s26 + $0x1d0] sm:$0xff] }
0x1432   :  { %v3293_v18 = vpop.permute.xlu0 %3292 }
0x1433   :  { %v3295_v38 = vadd.f32 %v3293_v18, %v3285_v17 }
0x1435   :  { %5056 = vtanh.f32 %v3295_v38 }
0x1442   :  { %v5057_v24 = vpop.eup %5056 }
0x1443   :  { %3298 = vrot.lane.b32.xlu1 %v5057_v24, %s5190_s29  ;;  %v4168_v24 = vld [vmem:[%s6448_s8 + $0x7] ss:$0 sm:$0xff] }
0x1447   :  { %3309 = vrot.lane.b32.xlu1 %v3295_v38, %s5191_s1 }
0x14b5   :  { %v3299_v25 = vpop.permute.xlu1 %3298 }
0x14b6   :  { %v3301_v26 = vmul.f32 %v5055_v56, %v3299_v25  ;;  %v4305_v56 = vld [vmem:[%s6447_s7 + $0x1c0] sm:$0xff]  ;;  %v1422_v25 = vadd.f32 %v4168_v24, %v5756_v0 }
0x14b7   :  { %v4184_v0 = vld [vmem:[%s6449_s9 + $0x7] ss:$0 sm:$0xff] }
0x14b8   :  { %3303 = vrot.lane.b32.xlu0 %v3301_v26, %s5189_s23 }
0x14b9   :  { %v3310_v27 = vpop.permute.xlu1 %3309 }
0x14ba   :  { %3313 = vst.msk [vmem:[#allocation9 + $0x28] sm:$0xff] %vm160_vm0, %v3310_v27  ;;  %4927 = vmatmul.mubr.msk.f32.vlgmr.msra.gmra.mxu1 %vm160_vm0, %v3310_v27 }
0x14bb   :  { %4948 = vmatprep.mubr.msk.f32.mxu1 %vm5187_vm1, %v5186_v2  ;;  %4941 = vmatpush3.msra.mxu1 %v4304_v15 }
0x14bc   :  { %1473 = vperm.xlu0 %5008, %v1431_v28   ;;  %4942 = vmatprep.subr.mxu1 %v5186_v2 }
0x14bd   :  { %4943 = vmatpush3.msra.mxu1 %v4303_v16 }
0x14be   :  { %4944 = vmatprep.subr.mxu1 %v5186_v2 }
0x14bf   :  { %4945 = vmatpush3.msra.mxu1 %v4302_v54 }
0x14c0   :  { %4946 = vmatprep.subr.mxu1 %v5186_v2 }
0x14c1   :  { %4947 = vmatpush3.msra.mxu1 %v4301_v40 }
0x14c2   :  { %4962 = vmatprep.subr.mxu1 %v5186_v2 }
0x152a   :  { %v3304_v30 = vpop.permute.xlu0 %3303 }
0x152b   :  { %3307 = vst.msk [vmem:[#allocation7 + $0x28] sm:$0xff] %vm160_vm0, %v3304_v30  ;;  %4916 = vmatmul.mubr.msk.f32.vlgmr.msra.gmra.mxu0 %vm160_vm0, %v3304_v30  ;;  %v4152_v30 = vld [vmem:[%s6446_s6 + $0x7] ss:$0 sm:$0xff] }
0x152c   :  { %4930 = vmatpush3.msra.mxu0 %v4298_v29  ;;  %4937 = vmatprep.mubr.msk.f32.mxu0 %vm5187_vm1, %v5186_v2 }
0x152d   :  { %4931 = vmatprep.subr.mxu0 %v5186_v2 }
0x152e   :  { %4932 = vmatpush3.msra.mxu0 %v4297_v31  ;;  %v742_v31 = vadd.f32 %v4152_v30, %v5742_v48 }
0x152f   :  { %4933 = vmatprep.subr.mxu0 %v5186_v2 }
0x1530   :  { %4934 = vmatpush3.msra.mxu0 %v4296_v32 }
0x1531   :  { %4935 = vmatprep.subr.mxu0 %v5186_v2 }
0x1532   :  { %4936 = vmatpush3.msra.mxu0 %v4295_v33 }
0x1533   :  { %4951 = vmatprep.subr.mxu0 %v5186_v2 }
0x1537   :  { %v1474_v55 = vpop.permute.xlu0 %1473 }
0x1538   :  { %v1535_v57 = vmul.f32 %v4183_v62, %v1474_v55 }
0x153a   :  { %v1599_v46 = vadd.f32 %v4191_v59, %v1535_v57 }
0x153c   :  { %v1663_v63 = vadd.f32 %v4199_v61, %v1599_v46  ;;  %v3871_v61 = vld [vmem:[%s6453_s13 + $0x38] sm:$0xff] }
0x157a   :  { %v3465_v37 = vpop.f32.mrf.mxu1 }
0x157b   :  { %v3466_v39 = vadd.f32 %v3465_v37, %v1349_v35 }
0x157c   :  { %v4928_v41 = vpop.f32.mrf.mxu1 }
0x157d   :  { %v3469_v43 = vmax.f32 %v3466_v39, 0.0  ;;  %v4192_v41 = vld [vmem:[%s6450_s10 + $0x7] ss:$0 sm:$0xff] }
0x157f   :  { %3557 = vrot.lane.b32.xlu0 %v3469_v43, %s5189_s23  ;;  %v4200_v43 = vld [vmem:[%s6452_s12 + $0x7] ss:$0 sm:$0xff] }
0x15eb   :  { %v3392_v49 = vpop.f32.mrf.mxu0 }
0x15ec   :  { %v3393_v50 = vadd.f32 %v3392_v49, %v669_v47 }
0x15ed   :  { %v4917_v51 = vpop.f32.mrf.mxu0 }
0x15ee   :  { %v3396_v53 = vmax.f32 %v3393_v50, 0.0 }
0x15f0   :  { %4938 = vmatmul.mubr.msk.f32.vlgmr.msra.gmra.mxu0 %vm160_vm0, %v3396_v53 }
0x15f1   :  { %4959 = vmatprep.mubr.msk.f32.mxu0 %vm5187_vm1, %v5186_v2  ;;  %4952 = vmatpush3.msra.mxu0 %v4308_v10  ;;  %v3558_v11 = vpop.permute.xlu0 %3557 }
0x15f2   :  { %4953 = vmatprep.subr.mxu0 %v5186_v2 }
0x15f3   :  { %4954 = vmatpush3.msra.mxu0 %v4307_v58 }
0x15f4   :  { %4955 = vmatprep.subr.mxu0 %v5186_v2 }
0x15f5   :  { %4956 = vmatpush3.msra.mxu0 %v4306_v14 }
0x15f6   :  { %4957 = vmatprep.subr.mxu0 %v5186_v2 }
0x15f7   :  { %4958 = vmatpush3.msra.mxu0 %v4305_v56 }
0x15f8   :  { %4973 = vmatprep.subr.mxu0 %v5186_v2 }
0x16b0   :  { %v3544_v1 = vpop.f32.mrf.mxu0 }
0x16b1   :  { %v3548_v3 = vadd.f32 %v3544_v1, %v1663_v63  ;;  %v3870_v63 = vld [vmem:[%s6453_s13 + $0x30] sm:$0xff] }
0x16b2   :  { %v4939_v4 = vpop.f32.mrf.mxu0 }
0x16b3   :  { %5058 = vtanh.f32 %v3548_v3  ;;  %v4300_v5 = vmul.f32 -1.442695, %v3548_v3 }
0x16b5   :  { %5060 = vpow2.f32 %v4300_v5  ;;  %v3869_v5 = vld [vmem:[%s6453_s13 + $0x28] sm:$0xff] }
0x16c0   :  { %v5059_v60 = vpop.eup %5058 }
0x16c1   :  { %3562 = vrot.lane.b32.xlu1 %v5059_v60, %s5190_s29 }
0x16c2   :  { %v5061_v6 = vpop.eup %5060 }
0x16c3   :  { %v3552_v7 = vadd.f32 1.0, %v5061_v6  ;;  %v3868_v6 = vld [vmem:[%s6453_s13 + $0x20] sm:$0xff] }
0x16c5   :  { %5062 = vrcp.f32 %v3552_v7  ;;  %v3867_v7 = vld [vmem:[%s6453_s13 + $0x18] sm:$0xff] }
0x16d2   :  { %v5063_v44 = vpop.eup %5062 }
0x16d3   :  { %v3560_v12 = vmul.f32 %v5063_v44, %v3558_v11 }
0x1733   :  { %v3563_v8 = vpop.permute.xlu1 %3562 }
0x1734   :  { %v3565_v9 = vmul.f32 %v5063_v44, %v3563_v8  ;;  %v3865_v8 = vld [vmem:[%s6453_s13 + $0x8] sm:$0xff] }
0x1736   :  { %3567 = vrot.lane.b32.xlu1 %v3565_v9, %s5189_s23  ;;  %v3864_v9 = vld [vmem:[%s6453_s13] sm:$0xff] }
0x17a8   :  { %v3568_v13 = vpop.permute.xlu1 %3567 }
0x17a9   :  { %v3570_v42 = vadd.f32 %v3568_v13, %v3560_v12 }
0x17ab   :  { %5064 = vtanh.f32 %v3570_v42 }
0x17b8   :  { %v5065_v52 = vpop.eup %5064 }
0x17b9   :  { %3573 = vrot.lane.b32.xlu0 %v5065_v52, %s5190_s29 }
0x17bd   :  { %3584 = vrot.lane.b32.xlu0 %v3570_v42, %s5191_s1 }
0x182b   :  { %v3574_v17 = vpop.permute.xlu0 %3573 }
0x182c   :  { %v3576_v18 = vmul.f32 %v5063_v44, %v3574_v17  ;;  %v3866_v44 = vld [vmem:[%s6453_s13 + $0x10] sm:$0xff]  ;;  %s5192_s13 = smov [#allocation4]  }
0x182e   :  { %3578 = vrot.lane.b32.xlu1 %v3576_v18, %s5189_s23 }
0x182f   :  { %v3585_v38 = vpop.permute.xlu0 %3584 }
0x1830   :  { %3588 = vst.msk [vmem:[#allocation9 + $0x30] sm:$0xff] %vm160_vm0, %v3585_v38  ;;  %4960 = vmatmul.mubr.msk.f32.vlgmr.msra.gmra.mxu0 %vm160_vm0, %v3585_v38 }
0x1831   :  { %4981 = vmatprep.mubr.msk.f32.mxu0 %vm5187_vm1, %v5186_v2  ;;  %4974 = vmatpush3.msra.mxu0 %v3871_v61 }
0x1832   :  { %1478 = vperm.xlu1 %5009, %v1432_v19   ;;  %4975 = vmatprep.subr.mxu0 %v5186_v2 }
0x1833   :  { %4976 = vmatpush3.msra.mxu0 %v3870_v63 }
0x1834   :  { %4977 = vmatprep.subr.mxu0 %v5186_v2 }
0x1835   :  { %4978 = vmatpush3.msra.mxu0 %v3869_v5 }
0x1836   :  { %4979 = vmatprep.subr.mxu0 %v5186_v2 }
0x1837   :  { %4980 = vmatpush3.msra.mxu0 %v3868_v6 }
0x18a0   :  { %v3579_v20 = vpop.permute.xlu1 %3578 }
0x18a1   :  { %3582 = vst.msk [vmem:[#allocation7 + $0x30] sm:$0xff] %vm160_vm0, %v3579_v20  ;;  %4949 = vmatmul.mubr.msk.f32.vlgmr.msra.gmra.mxu1 %vm160_vm0, %v3579_v20 }
0x18a2   :  { %4963 = vmatpush3.msra.mxu1 %v4314_v36  ;;  %4970 = vmatprep.mubr.msk.f32.mxu1 %vm5187_vm1, %v5186_v2 }
0x18a3   :  { %4964 = vmatprep.subr.mxu1 %v5186_v2 }
0x18a4   :  { %4965 = vmatpush3.msra.mxu1 %v4313_v21 }
0x18a5   :  { %4966 = vmatprep.subr.mxu1 %v5186_v2 }
0x18a6   :  { %4967 = vmatpush3.msra.mxu1 %v4312_v22 }
0x18a7   :  { %4968 = vmatprep.subr.mxu1 %v5186_v2 }
0x18a8   :  { %4969 = vmatpush3.msra.mxu1 %v4311_v23 }
0x18a9   :  { %4984 = vmatprep.subr.mxu1 %v5186_v2 }
0x18ad   :  { %v1479_v37 = vpop.permute.xlu1 %1478 }
0x18ae   :  { %v1536_v39 = vmul.f32 %v4184_v0, %v1479_v37 }
0x18b0   :  { %v1600_v48 = vadd.f32 %v4192_v41, %v1536_v39 }
0x18b2   :  { %v1664_v45 = vadd.f32 %v4200_v43, %v1600_v48 }
0x18f0   :  { %v3740_v26 = vpop.f32.mrf.mxu0 }
0x18f1   :  { %v3741_v27 = vadd.f32 %v3740_v26, %v1422_v25 }
0x18f2   :  { %v4961_v28 = vpop.f32.mrf.mxu0 }
0x18f3   :  { %v3744_v29 = vmax.f32 %v3741_v27, 0.0 }
0x18f5   :  { %3832 = vrot.lane.b32.xlu1 %v3744_v29, %s5189_s23 }
0x1961   :  { %v3667_v32 = vpop.f32.mrf.mxu1 }
0x1962   :  { %v3668_v33 = vadd.f32 %v3667_v32, %v742_v31 }
0x1963   :  { %v4950_v34 = vpop.f32.mrf.mxu1 }
0x1964   :  { %v3671_v35 = vmax.f32 %v3668_v33, 0.0 }
0x1966   :  { %4971 = vmatmul.mubr.msk.f32.vlgmr.msra.gmra.mxu1 %vm160_vm0, %v3671_v35 }
0x1967   :  { %4992 = vmatprep.mubr.msk.f32.mxu1 %vm5187_vm1, %v5186_v2  ;;  %v3833_v1 = vpop.permute.xlu1 %3832  ;;  %4985 = vmatpush3.msra.mxu1 %v3867_v7 }
0x1968   :  { %4986 = vmatprep.subr.mxu1 %v5186_v2 }
0x1969   :  { %4987 = vmatpush3.msra.mxu1 %v3866_v44 }
0x196a   :  { %4988 = vmatprep.subr.mxu1 %v5186_v2 }
0x196b   :  { %4989 = vmatpush3.msra.mxu1 %v3865_v8 }
0x196c   :  { %4990 = vmatprep.subr.mxu1 %v5186_v2 }
0x196d   :  { %4991 = vmatpush3.msra.mxu1 %v3864_v9 }
0x1a26   :  { %v3819_v47 = vpop.f32.mrf.mxu1 }
0x1a27   :  { %v3823_v49 = vadd.f32 %v3819_v47, %v1664_v45 }
0x1a28   :  { %v4972_v50 = vpop.f32.mrf.mxu1 }
0x1a29   :  { %5066 = vtanh.f32 %v3823_v49  ;;  %v4316_v53 = vmul.f32 -1.442695, %v3823_v49 }
0x1a2b   :  { %5068 = vpow2.f32 %v4316_v53 }
0x1a36   :  { %v5067_v51 = vpop.eup %5066 }
0x1a37   :  { %3837 = vrot.lane.b32.xlu0 %v5067_v51, %s5190_s29 }
0x1a38   :  { %v5069_v62 = vpop.eup %5068 }
0x1a39   :  { %v3827_v55 = vadd.f32 1.0, %v5069_v62 }
0x1a3b   :  { %5070 = vrcp.f32 %v3827_v55 }
0x1a48   :  { %v5071_v57 = vpop.eup %5070 }
0x1a49   :  { %v3835_v3 = vmul.f32 %v5071_v57, %v3833_v1 }
0x1aa9   :  { %v3838_v59 = vpop.permute.xlu0 %3837 }
0x1aaa   :  { %v3840_v46 = vmul.f32 %v5071_v57, %v3838_v59 }
0x1aac   :  { %3842 = vrot.lane.b32.xlu0 %v3840_v46, %s5189_s23 }
0x1b1e   :  { %v3843_v4 = vpop.permute.xlu0 %3842 }
0x1b1f   :  { %v3845_v60 = vadd.f32 %v3843_v4, %v3835_v3 }
0x1b21   :  { %5072 = vtanh.f32 %v3845_v60 }
0x1b2e   :  { %v5073_v10 = vpop.eup %5072 }
0x1b2f   :  { %3848 = vrot.lane.b32.xlu1 %v5073_v10, %s5190_s29  ;;  %s4089_s29 = sshll.u32 %s5192_s13, 4  ;;  %s4090_s29 = int_to_ptr.vmem [resolvable:$true] %s4089_s29 }
0x1b30   :  { %p5085_p1 = scmp.lt.s32.totalorder %s4090_s29, %s4090_s29 }
0x1b33   :  { %3859 = vrot.lane.b32.xlu1 %v3845_v60, %s5191_s1  ;;  %s5193_s1 = smov [#allocation7]  }
0x1b34   :  { %s4108_s26 = sshll.u32 %s5193_s1, 4  ;;  %s4109_s26 = int_to_ptr.vmem [resolvable:$true] %s4108_s26 }
0x1ba1   :  { %v3849_v58 = vpop.permute.xlu1 %3848 }
0x1ba2   :  { %v3851_v11 = vmul.f32 %v5071_v57, %v3849_v58 }
0x1ba4   :  { %3853 = vrot.lane.b32.xlu0 %v3851_v11, %s5189_s23  ;;  %s5080_s23 = scalar_lea.vmem %s4090_s29, 128 }
0x1ba5   :  { %v3860_v12 = vpop.permute.xlu1 %3859  ;;  %p5081_p0 = scmp.ne.s32.totalorder %s4090_s29, %s5080_s23  ;;  %p5086_p2 = scmp.lt.s32.totalorder %s5080_s23, %s5080_s23 }
0x1ba6   :  { %3863 = vst.msk [vmem:[#allocation9 + $0x38] sm:$0xff] %vm160_vm0, %v3860_v12  ;;  %4072 = vst.msk [vmem:[#allocation6] sm:$0xff] %vm160_vm0, %v3860_v12  ;;  %4982 = vmatmul.mubr.msk.f32.vlgmr.msra.gmra.mxu0 %vm160_vm0, %v3860_v12 }
0x1ba7   :  { %p5087_p3 = por %p5086_p2, %p5085_p1 }
0x1ba9   :  { %p5088_p4 = pnand %p5087_p3, %p5081_p0 }
0x1c16   :  { %v3854_v13 = vpop.permute.xlu0 %3853 }
0x1c17   :  { %3857 = vst.msk [vmem:[#allocation7 + $0x38] sm:$0xff] %vm160_vm0, %v3854_v13  ;;  %4071 = vst.msk [vmem:[#allocation4] sm:$0xff] %vm160_vm0, %v3854_v13  ;;  %4993 = vmatmul.mubr.msk.f32.vlgmr.msra.gmra.mxu1 %vm160_vm0, %v3854_v13 }
0x1c18   :  { %5091 = shalt.err (!%p5088_p4)
}
0x1c19   :  { %4092 = dma.vmem_to_hbm [thread:$0]  %s4090_s29, 128, %s6458_s18, [#allocation5]  }
0x1c1a   :  { %s5100_s9 = scalar_lea.vmem %s4109_s26, 1024  ;;  %p5105_p6 = scmp.lt.s32.totalorder %s4109_s26, %s4109_s26 }
0x1c1b   :  { %p5101_p5 = scmp.ne.s32.totalorder %s4109_s26, %s5100_s9  ;;  %p5106_p7 = scmp.lt.s32.totalorder %s5100_s9, %s5100_s9 }
0x1c1d   :  { %p5107_p8 = por %p5106_p7, %p5105_p6 }
0x1c1f   :  { %p5108_p9 = pnand %p5107_p8, %p5101_p5 }
0x1c21   :  { %5111 = shalt.err (!%p5108_p9)
}
0x1c22   :  { %s5194_s10 = smov 128   ;;  %s5195_s12 = smov 8  }
0x1c23   :  { %4114 = dma.vmem_to_hbm [thread:$0]  %s4109_s26, 1024, %s6460_s20, [#allocation8], %s5194_s10, %s5194_s10, %s5195_s12  }
0x1c24   :  { %s5196_s22 = smov [#allocation6]  }
0x1c25   :  { %s4099_s24 = sshll.u32 %s5196_s22, 4  ;;  %s4100_s24 = int_to_ptr.vmem [resolvable:$true] %s4099_s24 }
0x1c26   :  { %s5120_s2 = scalar_lea.vmem %s4100_s24, 128  ;;  %p5125_p11 = scmp.lt.s32.totalorder %s4100_s24, %s4100_s24 }
0x1c27   :  { %p5121_p10 = scmp.ne.s32.totalorder %s4100_s24, %s5120_s2  ;;  %p5126_p12 = scmp.lt.s32.totalorder %s5120_s2, %s5120_s2 }
0x1c29   :  { %p5127_p13 = por %p5126_p12, %p5125_p11 }
0x1c2b   :  { %p5128_p0 = pnand %p5127_p13, %p5121_p10 }
0x1c66   :  { %v3940_v2 = vpop.f32.mrf.mxu0 }
0x1c68   :  { %v4983_v42 = vpop.f32.mrf.mxu0 }
0x1c69   :  { %5131 = shalt.err (!%p5128_p0)
}
0x1c6a   :  { %4102 = dma.vmem_to_hbm [thread:$0]  %s4100_s24, 128, %s6459_s19, [#allocation5]  }
0x1c6b   :  { %s5197_s27 = smov [#allocation9]  }
0x1c6c   :  { %s4120_s7 = sshll.u32 %s5197_s27, 4  ;;  %s4121_s7 = int_to_ptr.vmem [resolvable:$true] %s4120_s7 }
0x1c6d   :  { %s5140_s20 = scalar_lea.vmem %s4121_s7, 1024  ;;  %p5145_p2 = scmp.lt.s32.totalorder %s4121_s7, %s4121_s7 }
0x1c6e   :  { %p5141_p1 = scmp.ne.s32.totalorder %s4121_s7, %s5140_s20  ;;  %p5146_p3 = scmp.lt.s32.totalorder %s5140_s20, %s5140_s20 }
0x1c70   :  { %p5147_p4 = por %p5146_p3, %p5145_p2 }
0x1c72   :  { %p5148_p5 = pnand %p5147_p4, %p5141_p1 }
0x1c74   :  { %5151 = shalt.err (!%p5148_p5)
}
0x1c75   :  { %4126 = dma.vmem_to_hbm [thread:$0]  %s4121_s7, 1024, %s6461_s21, [#allocation8], %s5194_s10, %s5194_s10, %s5195_s12   ;;  %vm4025_vm2 = vcmask 64512  }
0x1c76   :  { %v4319_v56 = vld [vmem:[%s6454_s14] ss:$0 sm:$0xff]  ;;  %s5198_s13 = smov [#allocation2]  }
0x1c77   :  { %v4320_v34 = vld [vmem:[%s6455_s15] ss:$0 sm:$0xff]  ;;  %s4079_s29 = sshll.u32 %s5198_s13, 4  ;;  %s4080_s29 = int_to_ptr.vmem [resolvable:$true] %s4079_s29 }
0x1c78   :  { %v4321_v0 = vld [vmem:[%s6456_s16] ss:$0 sm:$0xff]  ;;  %s5160_s1 = scalar_lea.vmem %s4080_s29, 128  ;;  %p5165_p7 = scmp.lt.s32.totalorder %s4080_s29, %s4080_s29 }
0x1c79   :  { %p5161_p6 = scmp.ne.s32.totalorder %s4080_s29, %s5160_s1  ;;  %p5166_p8 = scmp.lt.s32.totalorder %s5160_s1, %s5160_s1 }
0x1c7b   :  { %p5167_p9 = por %p5166_p8, %p5165_p7 }
0x1c7d   :  { %p5168_p10 = pnand %p5167_p9, %p5161_p6 }
0x1cd7   :  { %v4012_v14 = vpop.f32.mrf.mxu1 }
0x1cd8   :  { %v4013_v15 = vadd.f32 %v4012_v14, %v3940_v2 }
0x1cd9   :  { %v4994_v16 = vpop.f32.mrf.mxu1 }
0x1cda   :  { %v4023_v54 = vadd.f32 %v4319_v56, %v4013_v15 }
0x1cdc   :  { %v4024_v40 = vmax.f32 %v4023_v54, 0.0 }
0x1cde   :  { %v4026_v52 = vsel %vm4025_vm2, %v4024_v40, 0.0 }
0x1cdf   :  { %v4027_v17 = vrot.slane %v4026_v52, 4 }
0x1ce1   :  { %v4028_v18 = vadd.f32 %v4027_v17, %v4026_v52 }
0x1ce3   :  { %v4029_v38 = vrot.slane %v4028_v18, 2 }
0x1ce5   :  { %v4030_v19 = vadd.f32 %v4029_v38, %v4028_v18 }
0x1ce7   :  { %v4031_v36 = vrot.slane %v4030_v19, 1 }
0x1ce9   :  { %v4032_v20 = vadd.f32 %v4031_v36, %v4030_v19 }
0x1ceb   :  { %v4034_v21 = vmul.f32 0.125, %v4032_v20 }
0x1ced   :  { %v4035_v22 = vsub.f32 %v4024_v40, %v4034_v21 }
0x1cef   :  { %v4036_v23 = vmul.f32 %v4035_v22, %v4035_v22 }
0x1cf1   :  { %v4037_v24 = vsel %vm4025_vm2, %v4036_v23, 0.0 }
0x1cf2   :  { %v4038_v25 = vrot.slane %v4037_v24, 4 }
0x1cf4   :  { %v4039_v26 = vadd.f32 %v4038_v25, %v4037_v24 }
0x1cf6   :  { %v4040_v27 = vrot.slane %v4039_v26, 2 }
0x1cf8   :  { %v4041_v28 = vadd.f32 %v4040_v27, %v4039_v26 }
0x1cfa   :  { %v4042_v29 = vrot.slane %v4041_v28, 1 }
0x1cfc   :  { %v4043_v30 = vadd.f32 %v4042_v29, %v4041_v28 }
0x1cfe   :  { %v4044_v31 = vmul.f32 0.125, %v4043_v30 }
0x1d00   :  { %v4045_v32 = vadd.f32 1e-05, %v4044_v31 }
0x1d02   :  { %5074 = vrsqrt.f32 %v4045_v32 }
0x1d0f   :  { %v5075_v33 = vpop.eup %5074 }
0x1d10   :  { %v4047_v35 = vmul.f32 %v5075_v33, %v4035_v22 }
0x1d12   :  { %v4055_v37 = vmul.f32 %v4320_v34, %v4047_v35 }
0x1d14   :  { %v4063_v39 = vadd.f32 %v4321_v0, %v4055_v37 }
0x1d16   :  { %v4322_v41 = vmul.f32 -1.442695, %v4063_v39 }
0x1d18   :  { %5076 = vpow2.f32 %v4322_v41 }
0x1d25   :  { %v5077_v48 = vpop.eup %5076 }
0x1d26   :  { %v4067_v43 = vadd.f32 1.0, %v5077_v48 }
0x1d28   :  { %5078 = vrcp.f32 %v4067_v43 }
0x1d35   :  { %v5079_v45 = vpop.eup %5078 }
0x1d36   :  { %4070 = vst.msk [vmem:[#allocation2] sm:$0xff] %vm4025_vm2, %v5079_v45 }
0x1d37   :  { %5171 = shalt.err (!%p5168_p10)
}
0x1d38   :  { %4082 = dma.vmem_to_hbm [thread:$0]  %s4080_s29, 128, %s6457_s17, [#allocation3]  }
0x1d39   :  { %5180 = dma.done.wait [#allocation3], 128  }
0x1d3a   :  { %5181 = vsyncadd [#allocation3], 4294967168 }
0x1d3b   :  { %5182 = dma.done.wait [#allocation5], 256  }
0x1d3c   :  { %5183 = vsyncadd [#allocation5], 4294967040 }
0x1d3d   :  { %5184 = dma.done.wait [#allocation8], 2048  }
0x1d3e   :  { %5185 = vsyncadd [#allocation8], 4294965248 }
0x1d3f   :  { %4142 = vsyncpa [#allocation3], 1 }
0x1d40   :  { %4143 = vsyncpa [#allocation5], 1 }
0x1d41   :  { %4144 = vsyncpa [#allocation8], 1 }

</bundles_post_ra>
